<compile_context>
chip_gen: v7x
topology: tpu7x:2x2x1
jax: 0.10.0
libtpu: 0.0.40
codegen_flags: <defaults>
</compile_context>

<pallas_src>
import functools

import jax
import jax.numpy as jnp
from jax.experimental import pallas as pl
from jax.experimental.pallas import tpu as pltpu

XI = 10.0      # self.xi
EPS = 10.0     # self.eps
IP = 1         # self.ip
DROP_P = 0.2   # nn.Dropout(p=0.2)

_VMEM = pl.BlockSpec(memory_space=pltpu.MemorySpace.VMEM)


def _pool_over_t(flat, T, Dm):
    """Sum over time of a lane-dense [rows, T*Dm] value -> [rows, Dm] (static lane slices)."""
    acc = flat[:, 0:Dm]
    for t in range(1, T):
        acc = acc + flat[:, t * Dm:(t + 1) * Dm]
    return acc


# ----------------------------------------------------------------------------
# K1: clean forward — pool + nonzero count + gather (one-hot matmul) + matmul
#     + bias + exact softmax.  Emits pooled_x[mask_index] and count for reuse.
# ----------------------------------------------------------------------------
def _clean_fwd_kernel(x_ref, w_ref, b_ref, sel_ref, tgt_ref, px_ref, cnt_ref, *, B, T, dims):
    xs = x_ref[...]                                                    # [3B, T*D]
    pooled_parts, count_parts = [], []
    for m, Dm in enumerate(dims):
        xm = xs[m * B:(m + 1) * B, :]
        pooled_parts.append(_pool_over_t(xm, T, Dm))
        count_parts.append(_pool_over_t((xm != 0.0).astype(jnp.float32), T, Dm))
    pooled = jnp.concatenate(pooled_parts, axis=1)                     # [B, Dsum] (1/T in w)
    pooled_sel = jnp.dot(sel_ref[...], pooled,
                         preferred_element_type=jnp.float32)          # [Bm, Dsum] gather first
    feat_m = jnp.dot(pooled_sel, w_ref[...],
                     preferred_element_type=jnp.float32) + b_ref[...]  # [Bm, C]
    mx = jnp.max(feat_m, axis=1, keepdims=True)
    e = jnp.exp(feat_m - mx)
    tgt_ref[...] = e / jnp.sum(e, axis=1, keepdims=True)               # exact softmax (target path)
    px_ref[...] = pooled_sel
    cnt_ref[...] = jnp.concatenate(count_parts, axis=1)                # [B, Dsum]


def clean_fwd_pallas(x_stack, wcat, b, sel, *, B, T, dims):
    Bm, C, Dsum = sel.shape[0], wcat.shape[1], sum(dims)
    return pl.pallas_call(
        functools.partial(_clean_fwd_kernel, B=B, T=T, dims=dims),
        out_shape=(jax.ShapeDtypeStruct((Bm, C), jnp.float32),
                   jax.ShapeDtypeStruct((Bm, Dsum), jnp.float32),
                   jax.ShapeDtypeStruct((B, Dsum), jnp.float32)),
        in_specs=[_VMEM] * 4,
        out_specs=(_VMEM,) * 3,
    )(x_stack, wcat, b, sel)


# ----------------------------------------------------------------------------
# K2: initial random direction — mask, per-sample L2 normalize, T-pool.
#     Only the pooled [B, Dsum] form is ever written back to HBM.
# ----------------------------------------------------------------------------
def _init_dir_kernel(d_ref, x_ref, pd_ref, *, B, T, dims):
    d = d_ref[...] * (x_ref[...] != 0.0).astype(jnp.float32)          # d = d * mask
    s = jnp.sum(d * d, axis=1, keepdims=True)
    d = d * jax.lax.rsqrt(s + 1e-16)                                   # ~ d / (||d||_2 + 1e-8)
    parts = [_pool_over_t(d[m * B:(m + 1) * B, :], T, Dm) for m, Dm in enumerate(dims)]
    pd_ref[...] = jnp.concatenate(parts, axis=1)                       # sum_T(d) per modality


def init_dir_pallas(d_stack, x_stack, *, B, T, dims):
    return pl.pallas_call(
        functools.partial(_init_dir_kernel, B=B, T=T, dims=dims),
        out_shape=jax.ShapeDtypeStruct((B, sum(dims)), jnp.float32),
        in_specs=[_VMEM] * 2,
        out_specs=_VMEM,
    )(d_stack, x_stack)


# ----------------------------------------------------------------------------
# K3: analytic power iteration (fwd + bwd + l2norm*count update), and the fused
#     final variant that also computes the VAT KL loss.
# ----------------------------------------------------------------------------
def _adv_grad_step(pooled_d, count, px_sel, w, wT, bias, sel, selT, target, dm_hat,
                   *, xi, T, dims, bm):
    # perturbed forward at the masked rows (1/T of the mean-pool folded into w)
    pooled_d_sel = jnp.dot(sel, pooled_d, preferred_element_type=jnp.float32)
    feat_hat = jnp.dot(px_sel + xi * pooled_d_sel, w,
                       preferred_element_type=jnp.float32) + bias      # [Bm, C]
    z = feat_hat * dm_hat                                              # self.drop(feature_m_hat)
    zmax = jnp.max(z, axis=1, keepdims=True)
    e = jnp.exp(z - zmax)
    se = jnp.sum(e, axis=1, keepdims=True)
    q = e / se                                                         # softmax(z)
    logq = (z - zmax) - jnp.log(se)                                    # log_softmax(z)
    # KL(batchmean) value (for the clamp gate) and its analytic gradient wrt z
    safe_t = jnp.where(target > 0.0, target, 1.0)
    terms = jnp.where(target > 0.0, target * (jnp.log(safe_t) - logq), 0.0)
    kl_raw = jnp.sum(jnp.sum(terms, axis=1, keepdims=True), axis=0, keepdims=True) * (1.0 / bm)
    gate = (kl_raw > 0.0).astype(jnp.float32)                          # clamp_(min=0) kills grad
    rowsum_t = jnp.sum(target, axis=1, keepdims=True)
    dz = (q * rowsum_t - target) * (gate * (1.0 / bm))                 # dKL/dz
    dfeat = dz * dm_hat                                                # back through dropout
    dpool_sel = jnp.dot(dfeat, wT, preferred_element_type=jnp.float32)   # [Bm, Dsum]
    dpool = jnp.dot(selT, dpool_sel, preferred_element_type=jnp.float32)  # [B, Dsum] scatter
    g = xi * dpool                                                     # dKL/dd (constant over T)
    # d_new = _l2_normalize(grad) * mask; its T-pooled sum is g_norm * count
    parts, off = [], 0
    for Dm in dims:
        gm = g[:, off:off + Dm]
        s = jnp.sum(gm * gm, axis=1, keepdims=True) * float(T)         # ||grad||^2 over (T, Dm)
        parts.append(gm * jax.lax.rsqrt(s + 1e-16) * count[:, off:off + Dm])
        off += Dm
    return jnp.concatenate(parts, axis=1)                              # sum_T(new d)


def _power_iter_kernel(pd_ref, cnt_ref, px_ref, w_ref, wT_ref, b_ref, sel_ref, selT_ref,
                       tgt_ref, dmh_ref, out_ref, *, xi, T, dims, bm):
    out_ref[...] = _adv_grad_step(pd_ref[...], cnt_ref[...], px_ref[...], w_ref[...],
                                  wT_ref[...], b_ref[...], sel_ref[...], selT_ref[...],
                                  tgt_ref[...], dmh_ref[...], xi=xi, T=T, dims=dims, bm=bm)


def _power_iter_final_kernel(pd_ref, cnt_ref, px_ref, w_ref, wT_ref, b_ref, sel_ref, selT_ref,
                             tgt_ref, dmh_ref, dmv_ref, o_ref, *, xi, eps, T, dims, bm):
    w, bias, sel = w_ref[...], b_ref[...], sel_ref[...]
    px, tgt = px_ref[...], tgt_ref[...]
    pooled_d_new = _adv_grad_step(pd_ref[...], cnt_ref[...], px, w, wT_ref[...], bias, sel,
                                  selT_ref[...], tgt, dmh_ref[...],
                                  xi=xi, T=T, dims=dims, bm=bm)
    # final VAT forward: x + eps*d -> model -> [mask_index] -> dropout -> log_softmax -> KL
    pd_sel = jnp.dot(sel, pooled_d_new, preferred_element_type=jnp.float32)
    feat_vat = jnp.dot(px + eps * pd_sel, w, preferred_element_type=jnp.float32) + bias
    z = feat_vat * dmv_ref[...]
    zmax = jnp.max(z, axis=1, keepdims=True)
    lse = jnp.log(jnp.sum(jnp.exp(z - zmax), axis=1, keepdims=True)) + zmax
    logq = z - lse
    safe_t = jnp.where(tgt > 0.0, tgt, 1.0)
    terms = jnp.where(tgt > 0.0, tgt * (jnp.log(safe_t) - logq), 0.0)
    kl = jnp.sum(jnp.sum(terms, axis=1, keepdims=True), axis=0, keepdims=True) * (1.0 / bm)
    o_ref[...] = jnp.maximum(kl, 0.0)                                  # lds.clamp_(min=0.0)


def power_iter_pallas(pooled_d, count, px_sel, wcat, wcatT, b, sel, selT, target, dm_hat,
                      *, T, dims):
    B, Bm = pooled_d.shape[0], target.shape[0]
    return pl.pallas_call(
        functools.partial(_power_iter_kernel, xi=XI, T=T, dims=dims, bm=Bm),
        out_shape=jax.ShapeDtypeStruct((B, sum(dims)), jnp.float32),
        in_specs=[_VMEM] * 10,
        out_specs=_VMEM,
    )(pooled_d, count, px_sel, wcat, wcatT, b, sel, selT, target, dm_hat)


def power_iter_final_pallas(pooled_d, count, px_sel, wcat, wcatT, b, sel, selT, target,
                            dm_hat, dm_vat, *, T, dims):
    Bm = target.shape[0]
    return pl.pallas_call(
        functools.partial(_power_iter_final_kernel, xi=XI, eps=EPS, T=T, dims=dims, bm=Bm),
        out_shape=jax.ShapeDtypeStruct((1, 1), jnp.float32),
        in_specs=[_VMEM] * 11,
        out_specs=_VMEM,
    )(pooled_d, count, px_sel, wcat, wcatT, b, sel, selT, target, dm_hat, dm_vat)


# ----------------------------------------------------------------------------
# VATLoss.forward
# ----------------------------------------------------------------------------
def vat_loss(params, x0, x1, x2, mask_index, key):
    wt, wa, wv, b = params
    B, T, D0 = x0.shape
    D1, D2 = x1.shape[2], x2.shape[2]
    dims = (D0, D1, D2)
    C = wt.shape[1]
    Bm = mask_index.shape[0]
    W = T * D0
    assert T * D1 == W and T * D2 == W  # see TODO(synk) above re. unequal lane widths

    # tiny one-time layout prep (weights / gather matrix only — no activation concat)
    wcat = jnp.concatenate([wt, wa, wv], axis=0) * (1.0 / T)   # fold mean-pool 1/T into weight
    wcatT = wcat.T
    sel = jax.nn.one_hot(mask_index, B, dtype=jnp.float32)     # [Bm, B] one-hot gather matrix
    selT = sel.T
    # lane-dense stacked activations (built once; read only by K1 / K2)
    x_stack = jnp.concatenate(
        [x0.reshape(B, W), x1.reshape(B, W), x2.reshape(B, W)], axis=0)   # [3B, W]

    keys = jax.random.split(key, 4 + 2 * IP)

    # --- no_grad clean forward: target softmax + pooled_x[mask] + nonzero count ---
    target, px_sel, count = clean_fwd_pallas(x_stack, wcat, b, sel, B=B, T=T, dims=dims)

    # --- random directions (torch.rand(...).sub(offset)), mask+normalize+pool ---
    d_stack = jnp.concatenate(
        [jax.random.uniform(keys[0], (B, W), jnp.float32) - 0.5,
         jax.random.uniform(keys[1], (B, W), jnp.float32) - 0.4,
         jax.random.uniform(keys[2], (B, W), jnp.float32) - 0.3], axis=0)
    pooled_d = init_dir_pallas(d_stack, x_stack, B=B, T=T, dims=dims)

    # --- power iteration(s): analytic fused fwd+bwd, last one also emits the loss ---
    lds = None
    for it in range(IP):
        k_hat, k_fm = keys[3 + 2 * it], keys[4 + 2 * it]
        dm_hat = (jax.random.bernoulli(k_hat, 1.0 - DROP_P, (Bm, C))
                  / (1.0 - DROP_P)).astype(jnp.float32)
        dm_fm = (jax.random.bernoulli(k_fm, 1.0 - DROP_P, (Bm, C))
                 / (1.0 - DROP_P)).astype(jnp.float32)
        target = target * dm_fm                                # feature_m = drop_2(feature_m)
        if it == IP - 1:
            dm_vat = (jax.random.bernoulli(keys[3 + 2 * IP], 1.0 - DROP_P, (Bm, C))
                      / (1.0 - DROP_P)).astype(jnp.float32)
            lds = power_iter_final_pallas(pooled_d, count, px_sel, wcat, wcatT, b, sel, selT,
                                          target, dm_hat, dm_vat, T=T, dims=dims)
        else:
            pooled_d = power_iter_pallas(pooled_d, count, px_sel, wcat, wcatT, b, sel, selT,
                                         target, dm_hat, T=T, dims=dims)
    return lds[0, 0]


# ----------------------------------------------------------------------------
# Driver
# ----------------------------------------------------------------------------
if __name__ == "__main__":
    B, T, D_T, D_A, D_V, C = 4, 8, 16, 16, 16, 8

    root = jax.random.PRNGKey(0)
    kx0, kx1, kx2, kwt, kwa, kwv, kloss = jax.random.split(root, 7)

    # Modality inputs; zero-pad tail time steps so the (!=0) masks are non-trivial.
    x_text = jax.random.normal(kx0, (B, T, D_T), jnp.float32)
    x_text = x_text.at[:, T // 2:, :].set(0.0)
    x_audio = jax.random.normal(kx1, (B, T, D_A), jnp.float32)
    x_audio = x_audio.at[:, 3 * T // 4:, :].set(0.0)
    x_vision = jax.random.normal(kx2, (B, T, D_V), jnp.float32)
    x_vision = x_vision.at[:, T - 1:, :].set(0.0)

    # Deterministic synthetic model parameters (feature_m head).
    wt = 0.1 * jax.random.normal(kwt, (D_T, C), jnp.float32)
    wa = 0.1 * jax.random.normal(kwa, (D_A, C), jnp.float32)
    wv = 0.1 * jax.random.normal(kwv, (D_V, C), jnp.float32)
    b = jnp.zeros((1, C), jnp.float32)
    params = (wt, wa, wv, b)

    mask_index = jnp.array([0, 1, 2], dtype=jnp.int32)         # feature_m[mask_index]

    lds = jax.jit(vat_loss)(params, x_text, x_audio, x_vision, mask_index, kloss)
    jax.block_until_ready(lds)
    assert jnp.isfinite(lds)
    print("KERNEL_OK")
</pallas_src>

<mosaic_0001>
module attributes {stable_mosaic.version = 11 : i64} {
  func.func @_init_dir_kernel(%arg0: memref<12x128xf32, #tpu.memory_space<vmem>>, %arg1: memref<12x128xf32, #tpu.memory_space<vmem>>, %arg2: memref<4x48xf32, #tpu.memory_space<vmem>>) attributes {dimension_semantics = [], scalar_prefetch = 0 : i64, scratch_operands = 0 : i64, tpu.core_type = #tpu.core_type<tc>} {
    %c0 = arith.constant 0 : index
    %c0_0 = arith.constant 0 : index
    %0 = vector.load %arg0[%c0, %c0_0] : memref<12x128xf32, #tpu.memory_space<vmem>>, vector<12x128xf32>
    %c0_1 = arith.constant 0 : index
    %c0_2 = arith.constant 0 : index
    %1 = vector.load %arg1[%c0_1, %c0_2] : memref<12x128xf32, #tpu.memory_space<vmem>>, vector<12x128xf32>
    %cst = arith.constant 0.000000e+00 : f32
    %2 = vector.broadcast %cst : f32 to vector<12x128xf32>
    %3 = arith.cmpf one, %1, %2 : vector<12x128xf32>
    %4 = arith.extui %3 : vector<12x128xi1> to vector<12x128xi32>
    %5 = arith.sitofp %4 : vector<12x128xi32> to vector<12x128xf32>
    %6 = arith.mulf %0, %5 : vector<12x128xf32>
    %7 = arith.mulf %6, %6 : vector<12x128xf32>
    %cst_3 = arith.constant dense<0.000000e+00> : vector<12xf32>
    %8 = vector.multi_reduction <add>, %7, %cst_3 [1] : vector<12x128xf32> to vector<12xf32>
    %9 = vector.shape_cast %8 : vector<12xf32> to vector<12x1xf32>
    %cst_4 = arith.constant 1.000000e-16 : f32
    %10 = vector.broadcast %cst_4 : f32 to vector<12x1xf32>
    %11 = arith.addf %9, %10 : vector<12x1xf32>
    %12 = math.rsqrt %11 : vector<12x1xf32>
    %13 = vector.broadcast %12 : vector<12x1xf32> to vector<12x128xf32>
    %14 = arith.mulf %6, %13 : vector<12x128xf32>
    %15 = vector.extract_strided_slice %14 {offsets = [0, 0], sizes = [4, 128], strides = [1, 1]} : vector<12x128xf32> to vector<4x128xf32>
    %16 = vector.extract_strided_slice %15 {offsets = [0, 0], sizes = [4, 16], strides = [1, 1]} : vector<4x128xf32> to vector<4x16xf32>
    %17 = vector.extract_strided_slice %15 {offsets = [0, 16], sizes = [4, 16], strides = [1, 1]} : vector<4x128xf32> to vector<4x16xf32>
    %18 = arith.addf %16, %17 : vector<4x16xf32>
    %19 = vector.extract_strided_slice %15 {offsets = [0, 32], sizes = [4, 16], strides = [1, 1]} : vector<4x128xf32> to vector<4x16xf32>
    %20 = arith.addf %18, %19 : vector<4x16xf32>
    %21 = vector.extract_strided_slice %15 {offsets = [0, 48], sizes = [4, 16], strides = [1, 1]} : vector<4x128xf32> to vector<4x16xf32>
    %22 = arith.addf %20, %21 : vector<4x16xf32>
    %23 = vector.extract_strided_slice %15 {offsets = [0, 64], sizes = [4, 16], strides = [1, 1]} : vector<4x128xf32> to vector<4x16xf32>
    %24 = arith.addf %22, %23 : vector<4x16xf32>
    %25 = vector.extract_strided_slice %15 {offsets = [0, 80], sizes = [4, 16], strides = [1, 1]} : vector<4x128xf32> to vector<4x16xf32>
    %26 = arith.addf %24, %25 : vector<4x16xf32>
    %27 = vector.extract_strided_slice %15 {offsets = [0, 96], sizes = [4, 16], strides = [1, 1]} : vector<4x128xf32> to vector<4x16xf32>
    %28 = arith.addf %26, %27 : vector<4x16xf32>
    %29 = vector.extract_strided_slice %15 {offsets = [0, 112], sizes = [4, 16], strides = [1, 1]} : vector<4x128xf32> to vector<4x16xf32>
    %30 = arith.addf %28, %29 : vector<4x16xf32>
    %31 = vector.extract_strided_slice %14 {offsets = [4, 0], sizes = [4, 128], strides = [1, 1]} : vector<12x128xf32> to vector<4x128xf32>
    %32 = vector.extract_strided_slice %31 {offsets = [0, 0], sizes = [4, 16], strides = [1, 1]} : vector<4x128xf32> to vector<4x16xf32>
    %33 = vector.extract_strided_slice %31 {offsets = [0, 16], sizes = [4, 16], strides = [1, 1]} : vector<4x128xf32> to vector<4x16xf32>
    %34 = arith.addf %32, %33 : vector<4x16xf32>
    %35 = vector.extract_strided_slice %31 {offsets = [0, 32], sizes = [4, 16], strides = [1, 1]} : vector<4x128xf32> to vector<4x16xf32>
    %36 = arith.addf %34, %35 : vector<4x16xf32>
    %37 = vector.extract_strided_slice %31 {offsets = [0, 48], sizes = [4, 16], strides = [1, 1]} : vector<4x128xf32> to vector<4x16xf32>
    %38 = arith.addf %36, %37 : vector<4x16xf32>
    %39 = vector.extract_strided_slice %31 {offsets = [0, 64], sizes = [4, 16], strides = [1, 1]} : vector<4x128xf32> to vector<4x16xf32>
    %40 = arith.addf %38, %39 : vector<4x16xf32>
    %41 = vector.extract_strided_slice %31 {offsets = [0, 80], sizes = [4, 16], strides = [1, 1]} : vector<4x128xf32> to vector<4x16xf32>
    %42 = arith.addf %40, %41 : vector<4x16xf32>
    %43 = vector.extract_strided_slice %31 {offsets = [0, 96], sizes = [4, 16], strides = [1, 1]} : vector<4x128xf32> to vector<4x16xf32>
    %44 = arith.addf %42, %43 : vector<4x16xf32>
    %45 = vector.extract_strided_slice %31 {offsets = [0, 112], sizes = [4, 16], strides = [1, 1]} : vector<4x128xf32> to vector<4x16xf32>
    %46 = arith.addf %44, %45 : vector<4x16xf32>
    %47 = vector.extract_strided_slice %14 {offsets = [8, 0], sizes = [4, 128], strides = [1, 1]} : vector<12x128xf32> to vector<4x128xf32>
    %48 = vector.extract_strided_slice %47 {offsets = [0, 0], sizes = [4, 16], strides = [1, 1]} : vector<4x128xf32> to vector<4x16xf32>
    %49 = vector.extract_strided_slice %47 {offsets = [0, 16], sizes = [4, 16], strides = [1, 1]} : vector<4x128xf32> to vector<4x16xf32>
    %50 = arith.addf %48, %49 : vector<4x16xf32>
    %51 = vector.extract_strided_slice %47 {offsets = [0, 32], sizes = [4, 16], strides = [1, 1]} : vector<4x128xf32> to vector<4x16xf32>
    %52 = arith.addf %50, %51 : vector<4x16xf32>
    %53 = vector.extract_strided_slice %47 {offsets = [0, 48], sizes = [4, 16], strides = [1, 1]} : vector<4x128xf32> to vector<4x16xf32>
    %54 = arith.addf %52, %53 : vector<4x16xf32>
    %55 = vector.extract_strided_slice %47 {offsets = [0, 64], sizes = [4, 16], strides = [1, 1]} : vector<4x128xf32> to vector<4x16xf32>
    %56 = arith.addf %54, %55 : vector<4x16xf32>
    %57 = vector.extract_strided_slice %47 {offsets = [0, 80], sizes = [4, 16], strides = [1, 1]} : vector<4x128xf32> to vector<4x16xf32>
    %58 = arith.addf %56, %57 : vector<4x16xf32>
    %59 = vector.extract_strided_slice %47 {offsets = [0, 96], sizes = [4, 16], strides = [1, 1]} : vector<4x128xf32> to vector<4x16xf32>
    %60 = arith.addf %58, %59 : vector<4x16xf32>
    %61 = vector.extract_strided_slice %47 {offsets = [0, 112], sizes = [4, 16], strides = [1, 1]} : vector<4x128xf32> to vector<4x16xf32>
    %62 = arith.addf %60, %61 : vector<4x16xf32>
    %63 = tpu.concatenate %30, %46, %62 in 1 : vector<4x16xf32>, vector<4x16xf32>, vector<4x16xf32> -> vector<4x48xf32>
    %c0_5 = arith.constant 0 : index
    %c0_6 = arith.constant 0 : index
    %64 = vector.load %arg2[%c0_5, %c0_6] : memref<4x48xf32, #tpu.memory_space<vmem>>, vector<4x48xf32>
    tpu.vector_store %arg2[%c0_5, %c0_6], %63 {strides = array<i32>} : memref<4x48xf32, #tpu.memory_space<vmem>>, vector<4x48xf32>,
    return
  }
}

module attributes {stable_mosaic.version = 11 : i64} {
  func.func @_clean_fwd_kernel(%arg0: memref<12x128xf32, #tpu.memory_space<vmem>>, %arg1: memref<48x8xf32, #tpu.memory_space<vmem>>, %arg2: memref<1x8xf32, #tpu.memory_space<vmem>>, %arg3: memref<3x4xf32, #tpu.memory_space<vmem>>, %arg4: memref<3x8xf32, #tpu.memory_space<vmem>>, %arg5: memref<3x48xf32, #tpu.memory_space<vmem>>, %arg6: memref<4x48xf32, #tpu.memory_space<vmem>>) attributes {dimension_semantics = [], scalar_prefetch = 0 : i64, scratch_operands = 0 : i64, tpu.core_type = #tpu.core_type<tc>} {
    %c0 = arith.constant 0 : index
    %c0_0 = arith.constant 0 : index
    %0 = vector.load %arg0[%c0, %c0_0] : memref<12x128xf32, #tpu.memory_space<vmem>>, vector<12x128xf32>
    %1 = vector.extract_strided_slice %0 {offsets = [0, 0], sizes = [4, 128], strides = [1, 1]} : vector<12x128xf32> to vector<4x128xf32>
    %2 = vector.extract_strided_slice %1 {offsets = [0, 0], sizes = [4, 16], strides = [1, 1]} : vector<4x128xf32> to vector<4x16xf32>
    %3 = vector.extract_strided_slice %1 {offsets = [0, 16], sizes = [4, 16], strides = [1, 1]} : vector<4x128xf32> to vector<4x16xf32>
    %4 = arith.addf %2, %3 : vector<4x16xf32>
    %5 = vector.extract_strided_slice %1 {offsets = [0, 32], sizes = [4, 16], strides = [1, 1]} : vector<4x128xf32> to vector<4x16xf32>
    %6 = arith.addf %4, %5 : vector<4x16xf32>
    %7 = vector.extract_strided_slice %1 {offsets = [0, 48], sizes = [4, 16], strides = [1, 1]} : vector<4x128xf32> to vector<4x16xf32>
    %8 = arith.addf %6, %7 : vector<4x16xf32>
    %9 = vector.extract_strided_slice %1 {offsets = [0, 64], sizes = [4, 16], strides = [1, 1]} : vector<4x128xf32> to vector<4x16xf32>
    %10 = arith.addf %8, %9 : vector<4x16xf32>
    %11 = vector.extract_strided_slice %1 {offsets = [0, 80], sizes = [4, 16], strides = [1, 1]} : vector<4x128xf32> to vector<4x16xf32>
    %12 = arith.addf %10, %11 : vector<4x16xf32>
    %13 = vector.extract_strided_slice %1 {offsets = [0, 96], sizes = [4, 16], strides = [1, 1]} : vector<4x128xf32> to vector<4x16xf32>
    %14 = arith.addf %12, %13 : vector<4x16xf32>
    %15 = vector.extract_strided_slice %1 {offsets = [0, 112], sizes = [4, 16], strides = [1, 1]} : vector<4x128xf32> to vector<4x16xf32>
    %16 = arith.addf %14, %15 : vector<4x16xf32>
    %cst = arith.constant 0.000000e+00 : f32
    %17 = vector.broadcast %cst : f32 to vector<4x128xf32>
    %18 = arith.cmpf one, %1, %17 : vector<4x128xf32>
    %19 = arith.extui %18 : vector<4x128xi1> to vector<4x128xi32>
    %20 = arith.sitofp %19 : vector<4x128xi32> to vector<4x128xf32>
    %21 = vector.extract_strided_slice %20 {offsets = [0, 0], sizes = [4, 16], strides = [1, 1]} : vector<4x128xf32> to vector<4x16xf32>
    %22 = vector.extract_strided_slice %20 {offsets = [0, 16], sizes = [4, 16], strides = [1, 1]} : vector<4x128xf32> to vector<4x16xf32>
    %23 = arith.addf %21, %22 : vector<4x16xf32>
    %24 = vector.extract_strided_slice %20 {offsets = [0, 32], sizes = [4, 16], strides = [1, 1]} : vector<4x128xf32> to vector<4x16xf32>
    %25 = arith.addf %23, %24 : vector<4x16xf32>
    %26 = vector.extract_strided_slice %20 {offsets = [0, 48], sizes = [4, 16], strides = [1, 1]} : vector<4x128xf32> to vector<4x16xf32>
    %27 = arith.addf %25, %26 : vector<4x16xf32>
    %28 = vector.extract_strided_slice %20 {offsets = [0, 64], sizes = [4, 16], strides = [1, 1]} : vector<4x128xf32> to vector<4x16xf32>
    %29 = arith.addf %27, %28 : vector<4x16xf32>
    %30 = vector.extract_strided_slice %20 {offsets = [0, 80], sizes = [4, 16], strides = [1, 1]} : vector<4x128xf32> to vector<4x16xf32>
    %31 = arith.addf %29, %30 : vector<4x16xf32>
    %32 = vector.extract_strided_slice %20 {offsets = [0, 96], sizes = [4, 16], strides = [1, 1]} : vector<4x128xf32> to vector<4x16xf32>
    %33 = arith.addf %31, %32 : vector<4x16xf32>
    %34 = vector.extract_strided_slice %20 {offsets = [0, 112], sizes = [4, 16], strides = [1, 1]} : vector<4x128xf32> to vector<4x16xf32>
    %35 = arith.addf %33, %34 : vector<4x16xf32>
    %36 = vector.extract_strided_slice %0 {offsets = [4, 0], sizes = [4, 128], strides = [1, 1]} : vector<12x128xf32> to vector<4x128xf32>
    %37 = vector.extract_strided_slice %36 {offsets = [0, 0], sizes = [4, 16], strides = [1, 1]} : vector<4x128xf32> to vector<4x16xf32>
    %38 = vector.extract_strided_slice %36 {offsets = [0, 16], sizes = [4, 16], strides = [1, 1]} : vector<4x128xf32> to vector<4x16xf32>
    %39 = arith.addf %37, %38 : vector<4x16xf32>
    %40 = vector.extract_strided_slice %36 {offsets = [0, 32], sizes = [4, 16], strides = [1, 1]} : vector<4x128xf32> to vector<4x16xf32>
    %41 = arith.addf %39, %40 : vector<4x16xf32>
    %42 = vector.extract_strided_slice %36 {offsets = [0, 48], sizes = [4, 16], strides = [1, 1]} : vector<4x128xf32> to vector<4x16xf32>
    %43 = arith.addf %41, %42 : vector<4x16xf32>
    %44 = vector.extract_strided_slice %36 {offsets = [0, 64], sizes = [4, 16], strides = [1, 1]} : vector<4x128xf32> to vector<4x16xf32>
    %45 = arith.addf %43, %44 : vector<4x16xf32>
    %46 = vector.extract_strided_slice %36 {offsets = [0, 80], sizes = [4, 16], strides = [1, 1]} : vector<4x128xf32> to vector<4x16xf32>
    %47 = arith.addf %45, %46 : vector<4x16xf32>
    %48 = vector.extract_strided_slice %36 {offsets = [0, 96], sizes = [4, 16], strides = [1, 1]} : vector<4x128xf32> to vector<4x16xf32>
    %49 = arith.addf %47, %48 : vector<4x16xf32>
    %50 = vector.extract_strided_slice %36 {offsets = [0, 112], sizes = [4, 16], strides = [1, 1]} : vector<4x128xf32> to vector<4x16xf32>
    %51 = arith.addf %49, %50 : vector<4x16xf32>
    %cst_1 = arith.constant 0.000000e+00 : f32
    %52 = vector.broadcast %cst_1 : f32 to vector<4x128xf32>
    %53 = arith.cmpf one, %36, %52 : vector<4x128xf32>
    %54 = arith.extui %53 : vector<4x128xi1> to vector<4x128xi32>
    %55 = arith.sitofp %54 : vector<4x128xi32> to vector<4x128xf32>
    %56 = vector.extract_strided_slice %55 {offsets = [0, 0], sizes = [4, 16], strides = [1, 1]} : vector<4x128xf32> to vector<4x16xf32>
    %57 = vector.extract_strided_slice %55 {offsets = [0, 16], sizes = [4, 16], strides = [1, 1]} : vector<4x128xf32> to vector<4x16xf32>
    %58 = arith.addf %56, %57 : vector<4x16xf32>
    %59 = vector.extract_strided_slice %55 {offsets = [0, 32], sizes = [4, 16], strides = [1, 1]} : vector<4x128xf32> to vector<4x16xf32>
    %60 = arith.addf %58, %59 : vector<4x16xf32>
    %61 = vector.extract_strided_slice %55 {offsets = [0, 48], sizes = [4, 16], strides = [1, 1]} : vector<4x128xf32> to vector<4x16xf32>
    %62 = arith.addf %60, %61 : vector<4x16xf32>
    %63 = vector.extract_strided_slice %55 {offsets = [0, 64], sizes = [4, 16], strides = [1, 1]} : vector<4x128xf32> to vector<4x16xf32>
    %64 = arith.addf %62, %63 : vector<4x16xf32>
    %65 = vector.extract_strided_slice %55 {offsets = [0, 80], sizes = [4, 16], strides = [1, 1]} : vector<4x128xf32> to vector<4x16xf32>
    %66 = arith.addf %64, %65 : vector<4x16xf32>
    %67 = vector.extract_strided_slice %55 {offsets = [0, 96], sizes = [4, 16], strides = [1, 1]} : vector<4x128xf32> to vector<4x16xf32>
    %68 = arith.addf %66, %67 : vector<4x16xf32>
    %69 = vector.extract_strided_slice %55 {offsets = [0, 112], sizes = [4, 16], strides = [1, 1]} : vector<4x128xf32> to vector<4x16xf32>
    %70 = arith.addf %68, %69 : vector<4x16xf32>
    %71 = vector.extract_strided_slice %0 {offsets = [8, 0], sizes = [4, 128], strides = [1, 1]} : vector<12x128xf32> to vector<4x128xf32>
    %72 = vector.extract_strided_slice %71 {offsets = [0, 0], sizes = [4, 16], strides = [1, 1]} : vector<4x128xf32> to vector<4x16xf32>
    %73 = vector.extract_strided_slice %71 {offsets = [0, 16], sizes = [4, 16], strides = [1, 1]} : vector<4x128xf32> to vector<4x16xf32>
    %74 = arith.addf %72, %73 : vector<4x16xf32>
    %75 = vector.extract_strided_slice %71 {offsets = [0, 32], sizes = [4, 16], strides = [1, 1]} : vector<4x128xf32> to vector<4x16xf32>
    %76 = arith.addf %74, %75 : vector<4x16xf32>
    %77 = vector.extract_strided_slice %71 {offsets = [0, 48], sizes = [4, 16], strides = [1, 1]} : vector<4x128xf32> to vector<4x16xf32>
    %78 = arith.addf %76, %77 : vector<4x16xf32>
    %79 = vector.extract_strided_slice %71 {offsets = [0, 64], sizes = [4, 16], strides = [1, 1]} : vector<4x128xf32> to vector<4x16xf32>
    %80 = arith.addf %78, %79 : vector<4x16xf32>
    %81 = vector.extract_strided_slice %71 {offsets = [0, 80], sizes = [4, 16], strides = [1, 1]} : vector<4x128xf32> to vector<4x16xf32>
    %82 = arith.addf %80, %81 : vector<4x16xf32>
    %83 = vector.extract_strided_slice %71 {offsets = [0, 96], sizes = [4, 16], strides = [1, 1]} : vector<4x128xf32> to vector<4x16xf32>
    %84 = arith.addf %82, %83 : vector<4x16xf32>
    %85 = vector.extract_strided_slice %71 {offsets = [0, 112], sizes = [4, 16], strides = [1, 1]} : vector<4x128xf32> to vector<4x16xf32>
    %86 = arith.addf %84, %85 : vector<4x16xf32>
    %cst_2 = arith.constant 0.000000e+00 : f32
    %87 = vector.broadcast %cst_2 : f32 to vector<4x128xf32>
    %88 = arith.cmpf one, %71, %87 : vector<4x128xf32>
    %89 = arith.extui %88 : vector<4x128xi1> to vector<4x128xi32>
    %90 = arith.sitofp %89 : vector<4x128xi32> to vector<4x128xf32>
    %91 = vector.extract_strided_slice %90 {offsets = [0, 0], sizes = [4, 16], strides = [1, 1]} : vector<4x128xf32> to vector<4x16xf32>
    %92 = vector.extract_strided_slice %90 {offsets = [0, 16], sizes = [4, 16], strides = [1, 1]} : vector<4x128xf32> to vector<4x16xf32>
    %93 = arith.addf %91, %92 : vector<4x16xf32>
    %94 = vector.extract_strided_slice %90 {offsets = [0, 32], sizes = [4, 16], strides = [1, 1]} : vector<4x128xf32> to vector<4x16xf32>
    %95 = arith.addf %93, %94 : vector<4x16xf32>
    %96 = vector.extract_strided_slice %90 {offsets = [0, 48], sizes = [4, 16], strides = [1, 1]} : vector<4x128xf32> to vector<4x16xf32>
    %97 = arith.addf %95, %96 : vector<4x16xf32>
    %98 = vector.extract_strided_slice %90 {offsets = [0, 64], sizes = [4, 16], strides = [1, 1]} : vector<4x128xf32> to vector<4x16xf32>
    %99 = arith.addf %97, %98 : vector<4x16xf32>
    %100 = vector.extract_strided_slice %90 {offsets = [0, 80], sizes = [4, 16], strides = [1, 1]} : vector<4x128xf32> to vector<4x16xf32>
    %101 = arith.addf %99, %100 : vector<4x16xf32>
    %102 = vector.extract_strided_slice %90 {offsets = [0, 96], sizes = [4, 16], strides = [1, 1]} : vector<4x128xf32> to vector<4x16xf32>
    %103 = arith.addf %101, %102 : vector<4x16xf32>
    %104 = vector.extract_strided_slice %90 {offsets = [0, 112], sizes = [4, 16], strides = [1, 1]} : vector<4x128xf32> to vector<4x16xf32>
    %105 = arith.addf %103, %104 : vector<4x16xf32>
    %106 = tpu.concatenate %16, %51, %86 in 1 : vector<4x16xf32>, vector<4x16xf32>, vector<4x16xf32> -> vector<4x48xf32>
    %c0_3 = arith.constant 0 : index
    %c0_4 = arith.constant 0 : index
    %107 = vector.load %arg3[%c0_3, %c0_4] : memref<3x4xf32, #tpu.memory_space<vmem>>, vector<3x4xf32>
    %cst_5 = arith.constant dense<0.000000e+00> : vector<3x48xf32>
    %108 = tpu.matmul %107, %106, %cst_5 {dimension_numbers = #tpu.dot_dimension_numbers<[1], [0], [0], [1], [0, 0, 1, 1], [], []>} : vector<3x4xf32>, vector<4x48xf32>, vector<3x48xf32> -> vector<3x48xf32>
    %c0_6 = arith.constant 0 : index
    %c0_7 = arith.constant 0 : index
    %109 = vector.load %arg1[%c0_6, %c0_7] : memref<48x8xf32, #tpu.memory_space<vmem>>, vector<48x8xf32>
    %cst_8 = arith.constant dense<0.000000e+00> : vector<3x8xf32>
    %110 = tpu.matmul %108, %109, %cst_8 {dimension_numbers = #tpu.dot_dimension_numbers<[1], [0], [0], [1], [0, 0, 1, 1], [], []>} : vector<3x48xf32>, vector<48x8xf32>, vector<3x8xf32> -> vector<3x8xf32>
    %c0_9 = arith.constant 0 : index
    %c0_10 = arith.constant 0 : index
    %111 = vector.load %arg2[%c0_9, %c0_10] : memref<1x8xf32, #tpu.memory_space<vmem>>, vector<1x8xf32>
    %112 = vector.broadcast %111 : vector<1x8xf32> to vector<3x8xf32>
    %113 = arith.addf %110, %112 : vector<3x8xf32>
    %cst_11 = arith.constant dense<0xFF800000> : vector<3xf32>
    %114 = vector.multi_reduction <maximumf>, %113, %cst_11 [1] : vector<3x8xf32> to vector<3xf32>
    %115 = vector.shape_cast %114 : vector<3xf32> to vector<3x1xf32>
    %116 = vector.broadcast %115 : vector<3x1xf32> to vector<3x8xf32>
    %117 = arith.subf %113, %116 : vector<3x8xf32>
    %118 = math.exp %117 : vector<3x8xf32>
    %cst_12 = arith.constant dense<0.000000e+00> : vector<3xf32>
    %119 = vector.multi_reduction <add>, %118, %cst_12 [1] : vector<3x8xf32> to vector<3xf32>
    %120 = vector.shape_cast %119 : vector<3xf32> to vector<3x1xf32>
    %121 = vector.broadcast %120 : vector<3x1xf32> to vector<3x8xf32>
    %122 = arith.divf %118, %121 : vector<3x8xf32>
    %c0_13 = arith.constant 0 : index
    %c0_14 = arith.constant 0 : index
    %123 = vector.load %arg4[%c0_13, %c0_14] : memref<3x8xf32, #tpu.memory_space<vmem>>, vector<3x8xf32>
    tpu.vector_store %arg4[%c0_13, %c0_14], %122 {strides = array<i32>} : memref<3x8xf32, #tpu.memory_space<vmem>>, vector<3x8xf32>,
    %c0_15 = arith.constant 0 : index
    %c0_16 = arith.constant 0 : index
    %124 = vector.load %arg5[%c0_15, %c0_16] : memref<3x48xf32, #tpu.memory_space<vmem>>, vector<3x48xf32>
    tpu.vector_store %arg5[%c0_15, %c0_16], %108 {strides = array<i32>} : memref<3x48xf32, #tpu.memory_space<vmem>>, vector<3x48xf32>,
    %125 = tpu.concatenate %35, %70, %105 in 1 : vector<4x16xf32>, vector<4x16xf32>, vector<4x16xf32> -> vector<4x48xf32>
    %c0_17 = arith.constant 0 : index
    %c0_18 = arith.constant 0 : index
    %126 = vector.load %arg6[%c0_17, %c0_18] : memref<4x48xf32, #tpu.memory_space<vmem>>, vector<4x48xf32>
    tpu.vector_store %arg6[%c0_17, %c0_18], %125 {strides = array<i32>} : memref<4x48xf32, #tpu.memory_space<vmem>>, vector<4x48xf32>,
    return
  }
}

module attributes {stable_mosaic.version = 11 : i64} {
  func.func @_power_iter_final_kernel(%arg0: memref<4x48xf32, #tpu.memory_space<vmem>>, %arg1: memref<4x48xf32, #tpu.memory_space<vmem>>, %arg2: memref<3x48xf32, #tpu.memory_space<vmem>>, %arg3: memref<48x8xf32, #tpu.memory_space<vmem>>, %arg4: memref<8x48xf32, #tpu.memory_space<vmem>>, %arg5: memref<1x8xf32, #tpu.memory_space<vmem>>, %arg6: memref<3x4xf32, #tpu.memory_space<vmem>>, %arg7: memref<4x3xf32, #tpu.memory_space<vmem>>, %arg8: memref<3x8xf32, #tpu.memory_space<vmem>>, %arg9: memref<3x8xf32, #tpu.memory_space<vmem>>, %arg10: memref<3x8xf32, #tpu.memory_space<vmem>>, %arg11: memref<1x1xf32, #tpu.memory_space<vmem>>) attributes {dimension_semantics = [], scalar_prefetch = 0 : i64, scratch_operands = 0 : i64, tpu.core_type = #tpu.core_type<tc>} {
    %c0 = arith.constant 0 : index
    %c0_0 = arith.constant 0 : index
    %0 = vector.load %arg3[%c0, %c0_0] : memref<48x8xf32, #tpu.memory_space<vmem>>, vector<48x8xf32>
    %c0_1 = arith.constant 0 : index
    %c0_2 = arith.constant 0 : index
    %1 = vector.load %arg5[%c0_1, %c0_2] : memref<1x8xf32, #tpu.memory_space<vmem>>, vector<1x8xf32>
    %c0_3 = arith.constant 0 : index
    %c0_4 = arith.constant 0 : index
    %2 = vector.load %arg6[%c0_3, %c0_4] : memref<3x4xf32, #tpu.memory_space<vmem>>, vector<3x4xf32>
    %c0_5 = arith.constant 0 : index
    %c0_6 = arith.constant 0 : index
    %3 = vector.load %arg2[%c0_5, %c0_6] : memref<3x48xf32, #tpu.memory_space<vmem>>, vector<3x48xf32>
    %c0_7 = arith.constant 0 : index
    %c0_8 = arith.constant 0 : index
    %4 = vector.load %arg8[%c0_7, %c0_8] : memref<3x8xf32, #tpu.memory_space<vmem>>, vector<3x8xf32>
    %c0_9 = arith.constant 0 : index
    %c0_10 = arith.constant 0 : index
    %5 = vector.load %arg0[%c0_9, %c0_10] : memref<4x48xf32, #tpu.memory_space<vmem>>, vector<4x48xf32>
    %c0_11 = arith.constant 0 : index
    %c0_12 = arith.constant 0 : index
    %6 = vector.load %arg1[%c0_11, %c0_12] : memref<4x48xf32, #tpu.memory_space<vmem>>, vector<4x48xf32>
    %c0_13 = arith.constant 0 : index
    %c0_14 = arith.constant 0 : index
    %7 = vector.load %arg4[%c0_13, %c0_14] : memref<8x48xf32, #tpu.memory_space<vmem>>, vector<8x48xf32>
    %c0_15 = arith.constant 0 : index
    %c0_16 = arith.constant 0 : index
    %8 = vector.load %arg7[%c0_15, %c0_16] : memref<4x3xf32, #tpu.memory_space<vmem>>, vector<4x3xf32>
    %c0_17 = arith.constant 0 : index
    %c0_18 = arith.constant 0 : index
    %9 = vector.load %arg9[%c0_17, %c0_18] : memref<3x8xf32, #tpu.memory_space<vmem>>, vector<3x8xf32>
    %cst = arith.constant dense<0.000000e+00> : vector<3x48xf32>
    %10 = tpu.matmul %2, %5, %cst {dimension_numbers = #tpu.dot_dimension_numbers<[1], [0], [0], [1], [0, 0, 1, 1], [], []>} : vector<3x4xf32>, vector<4x48xf32>, vector<3x48xf32> -> vector<3x48xf32>
    %cst_19 = arith.constant 1.000000e+01 : f32
    %11 = vector.broadcast %cst_19 : f32 to vector<3x48xf32>
    %12 = arith.mulf %11, %10 : vector<3x48xf32>
    %13 = arith.addf %3, %12 : vector<3x48xf32>
    %cst_20 = arith.constant dense<0.000000e+00> : vector<3x8xf32>
    %14 = tpu.matmul %13, %0, %cst_20 {dimension_numbers = #tpu.dot_dimension_numbers<[1], [0], [0], [1], [0, 0, 1, 1], [], []>} : vector<3x48xf32>, vector<48x8xf32>, vector<3x8xf32> -> vector<3x8xf32>
    %15 = vector.broadcast %1 : vector<1x8xf32> to vector<3x8xf32>
    %16 = arith.addf %14, %15 : vector<3x8xf32>
    %17 = arith.mulf %16, %9 : vector<3x8xf32>
    %cst_21 = arith.constant dense<0xFF800000> : vector<3xf32>
    %18 = vector.multi_reduction <maximumf>, %17, %cst_21 [1] : vector<3x8xf32> to vector<3xf32>
    %19 = vector.shape_cast %18 : vector<3xf32> to vector<3x1xf32>
    %20 = vector.broadcast %19 : vector<3x1xf32> to vector<3x8xf32>
    %21 = arith.subf %17, %20 : vector<3x8xf32>
    %22 = math.exp %21 : vector<3x8xf32>
    %cst_22 = arith.constant dense<0.000000e+00> : vector<3xf32>
    %23 = vector.multi_reduction <add>, %22, %cst_22 [1] : vector<3x8xf32> to vector<3xf32>
    %24 = vector.shape_cast %23 : vector<3xf32> to vector<3x1xf32>
    %25 = vector.broadcast %24 : vector<3x1xf32> to vector<3x8xf32>
    %26 = arith.divf %22, %25 : vector<3x8xf32>
    %27 = vector.broadcast %19 : vector<3x1xf32> to vector<3x8xf32>
    %28 = arith.subf %17, %27 : vector<3x8xf32>
    %29 = math.log %24 : vector<3x1xf32>
    %30 = vector.broadcast %29 : vector<3x1xf32> to vector<3x8xf32>
    %31 = arith.subf %28, %30 : vector<3x8xf32>
    %cst_23 = arith.constant 0.000000e+00 : f32
    %32 = vector.broadcast %cst_23 : f32 to vector<3x8xf32>
    %33 = arith.cmpf ogt, %4, %32 : vector<3x8xf32>
    %cst_24 = arith.constant 1.000000e+00 : f32
    %34 = vector.broadcast %cst_24 : f32 to vector<3x8xf32>
    %35 = arith.select %33, %4, %34 : vector<3x8xi1>, vector<3x8xf32>
    %cst_25 = arith.constant 0.000000e+00 : f32
    %36 = vector.broadcast %cst_25 : f32 to vector<3x8xf32>
    %37 = arith.cmpf ogt, %4, %36 : vector<3x8xf32>
    %38 = math.log %35 : vector<3x8xf32>
    %39 = arith.subf %38, %31 : vector<3x8xf32>
    %40 = arith.mulf %4, %39 : vector<3x8xf32>
    %cst_26 = arith.constant 0.000000e+00 : f32
    %41 = vector.broadcast %cst_26 : f32 to vector<3x8xf32>
    %42 = arith.select %37, %40, %41 : vector<3x8xi1>, vector<3x8xf32>
    %cst_27 = arith.constant dense<0.000000e+00> : vector<3xf32>
    %43 = vector.multi_reduction <add>, %42, %cst_27 [1] : vector<3x8xf32> to vector<3xf32>
    %44 = vector.shape_cast %43 : vector<3xf32> to vector<3x1xf32>
    %cst_28 = arith.constant dense<0.000000e+00> : vector<1xf32>
    %45 = vector.multi_reduction <add>, %44, %cst_28 [0] : vector<3x1xf32> to vector<1xf32>
    %46 = vector.shape_cast %45 : vector<1xf32> to vector<1x1xf32>
    %cst_29 = arith.constant 0.333333343 : f32
    %47 = vector.broadcast %cst_29 : f32 to vector<1x1xf32>
    %48 = arith.mulf %46, %47 : vector<1x1xf32>
    %cst_30 = arith.constant 0.000000e+00 : f32
    %49 = vector.broadcast %cst_30 : f32 to vector<1x1xf32>
    %50 = arith.cmpf ogt, %48, %49 : vector<1x1xf32>
    %51 = arith.extui %50 : vector<1x1xi1> to vector<1x1xi32>
    %52 = arith.sitofp %51 : vector<1x1xi32> to vector<1x1xf32>
    %cst_31 = arith.constant dense<0.000000e+00> : vector<3xf32>
    %53 = vector.multi_reduction <add>, %4, %cst_31 [1] : vector<3x8xf32> to vector<3xf32>
    %54 = vector.shape_cast %53 : vector<3xf32> to vector<3x1xf32>
    %55 = vector.broadcast %54 : vector<3x1xf32> to vector<3x8xf32>
    %56 = arith.mulf %26, %55 : vector<3x8xf32>
    %57 = arith.subf %56, %4 : vector<3x8xf32>
    %cst_32 = arith.constant 0.333333343 : f32
    %58 = vector.broadcast %cst_32 : f32 to vector<1x1xf32>
    %59 = arith.mulf %52, %58 : vector<1x1xf32>
    %60 = vector.broadcast %59 : vector<1x1xf32> to vector<3x8xf32>
    %61 = arith.mulf %57, %60 : vector<3x8xf32>
    %62 = arith.mulf %61, %9 : vector<3x8xf32>
    %cst_33 = arith.constant dense<0.000000e+00> : vector<3x48xf32>
    %63 = tpu.matmul %62, %7, %cst_33 {dimension_numbers = #tpu.dot_dimension_numbers<[1], [0], [0], [1], [0, 0, 1, 1], [], []>} : vector<3x8xf32>, vector<8x48xf32>, vector<3x48xf32> -> vector<3x48xf32>
    %cst_34 = arith.constant dense<0.000000e+00> : vector<4x48xf32>
    %64 = tpu.matmul %8, %63, %cst_34 {dimension_numbers = #tpu.dot_dimension_numbers<[1], [0], [0], [1], [0, 0, 1, 1], [], []>} : vector<4x3xf32>, vector<3x48xf32>, vector<4x48xf32> -> vector<4x48xf32>
    %cst_35 = arith.constant 1.000000e+01 : f32
    %65 = vector.broadcast %cst_35 : f32 to vector<4x48xf32>
    %66 = arith.mulf %65, %64 : vector<4x48xf32>
    %67 = vector.extract_strided_slice %66 {offsets = [0, 0], sizes = [4, 16], strides = [1, 1]} : vector<4x48xf32> to vector<4x16xf32>
    %68 = arith.mulf %67, %67 : vector<4x16xf32>
    %cst_36 = arith.constant dense<0.000000e+00> : vector<4xf32>
    %69 = vector.multi_reduction <add>, %68, %cst_36 [1] : vector<4x16xf32> to vector<4xf32>
    %70 = vector.shape_cast %69 : vector<4xf32> to vector<4x1xf32>
    %cst_37 = arith.constant 8.000000e+00 : f32
    %71 = vector.broadcast %cst_37 : f32 to vector<4x1xf32>
    %72 = arith.mulf %70, %71 : vector<4x1xf32>
    %cst_38 = arith.constant 1.000000e-16 : f32
    %73 = vector.broadcast %cst_38 : f32 to vector<4x1xf32>
    %74 = arith.addf %72, %73 : vector<4x1xf32>
    %75 = math.rsqrt %74 : vector<4x1xf32>
    %76 = vector.broadcast %75 : vector<4x1xf32> to vector<4x16xf32>
    %77 = arith.mulf %67, %76 : vector<4x16xf32>
    %78 = vector.extract_strided_slice %6 {offsets = [0, 0], sizes = [4, 16], strides = [1, 1]} : vector<4x48xf32> to vector<4x16xf32>
    %79 = arith.mulf %77, %78 : vector<4x16xf32>
    %80 = vector.extract_strided_slice %66 {offsets = [0, 16], sizes = [4, 16], strides = [1, 1]} : vector<4x48xf32> to vector<4x16xf32>
    %81 = arith.mulf %80, %80 : vector<4x16xf32>
    %cst_39 = arith.constant dense<0.000000e+00> : vector<4xf32>
    %82 = vector.multi_reduction <add>, %81, %cst_39 [1] : vector<4x16xf32> to vector<4xf32>
    %83 = vector.shape_cast %82 : vector<4xf32> to vector<4x1xf32>
    %cst_40 = arith.constant 8.000000e+00 : f32
    %84 = vector.broadcast %cst_40 : f32 to vector<4x1xf32>
    %85 = arith.mulf %83, %84 : vector<4x1xf32>
    %cst_41 = arith.constant 1.000000e-16 : f32
    %86 = vector.broadcast %cst_41 : f32 to vector<4x1xf32>
    %87 = arith.addf %85, %86 : vector<4x1xf32>
    %88 = math.rsqrt %87 : vector<4x1xf32>
    %89 = vector.broadcast %88 : vector<4x1xf32> to vector<4x16xf32>
    %90 = arith.mulf %80, %89 : vector<4x16xf32>
    %91 = vector.extract_strided_slice %6 {offsets = [0, 16], sizes = [4, 16], strides = [1, 1]} : vector<4x48xf32> to vector<4x16xf32>
    %92 = arith.mulf %90, %91 : vector<4x16xf32>
    %93 = vector.extract_strided_slice %66 {offsets = [0, 32], sizes = [4, 16], strides = [1, 1]} : vector<4x48xf32> to vector<4x16xf32>
    %94 = arith.mulf %93, %93 : vector<4x16xf32>
    %cst_42 = arith.constant dense<0.000000e+00> : vector<4xf32>
    %95 = vector.multi_reduction <add>, %94, %cst_42 [1] : vector<4x16xf32> to vector<4xf32>
    %96 = vector.shape_cast %95 : vector<4xf32> to vector<4x1xf32>
    %cst_43 = arith.constant 8.000000e+00 : f32
    %97 = vector.broadcast %cst_43 : f32 to vector<4x1xf32>
    %98 = arith.mulf %96, %97 : vector<4x1xf32>
    %cst_44 = arith.constant 1.000000e-16 : f32
    %99 = vector.broadcast %cst_44 : f32 to vector<4x1xf32>
    %100 = arith.addf %98, %99 : vector<4x1xf32>
    %101 = math.rsqrt %100 : vector<4x1xf32>
    %102 = vector.broadcast %101 : vector<4x1xf32> to vector<4x16xf32>
    %103 = arith.mulf %93, %102 : vector<4x16xf32>
    %104 = vector.extract_strided_slice %6 {offsets = [0, 32], sizes = [4, 16], strides = [1, 1]} : vector<4x48xf32> to vector<4x16xf32>
    %105 = arith.mulf %103, %104 : vector<4x16xf32>
    %106 = tpu.concatenate %79, %92, %105 in 1 : vector<4x16xf32>, vector<4x16xf32>, vector<4x16xf32> -> vector<4x48xf32>
    %cst_45 = arith.constant dense<0.000000e+00> : vector<3x48xf32>
    %107 = tpu.matmul %2, %106, %cst_45 {dimension_numbers = #tpu.dot_dimension_numbers<[1], [0], [0], [1], [0, 0, 1, 1], [], []>} : vector<3x4xf32>, vector<4x48xf32>, vector<3x48xf32> -> vector<3x48xf32>
    %cst_46 = arith.constant 1.000000e+01 : f32
    %108 = vector.broadcast %cst_46 : f32 to vector<3x48xf32>
    %109 = arith.mulf %108, %107 : vector<3x48xf32>
    %110 = arith.addf %3, %109 : vector<3x48xf32>
    %cst_47 = arith.constant dense<0.000000e+00> : vector<3x8xf32>
    %111 = tpu.matmul %110, %0, %cst_47 {dimension_numbers = #tpu.dot_dimension_numbers<[1], [0], [0], [1], [0, 0, 1, 1], [], []>} : vector<3x48xf32>, vector<48x8xf32>, vector<3x8xf32> -> vector<3x8xf32>
    %112 = vector.broadcast %1 : vector<1x8xf32> to vector<3x8xf32>
    %113 = arith.addf %111, %112 : vector<3x8xf32>
    %c0_48 = arith.constant 0 : index
    %c0_49 = arith.constant 0 : index
    %114 = vector.load %arg10[%c0_48, %c0_49] : memref<3x8xf32, #tpu.memory_space<vmem>>, vector<3x8xf32>
    %115 = arith.mulf %113, %114 : vector<3x8xf32>
    %cst_50 = arith.constant dense<0xFF800000> : vector<3xf32>
    %116 = vector.multi_reduction <maximumf>, %115, %cst_50 [1] : vector<3x8xf32> to vector<3xf32>
    %117 = vector.shape_cast %116 : vector<3xf32> to vector<3x1xf32>
    %118 = vector.broadcast %117 : vector<3x1xf32> to vector<3x8xf32>
    %119 = arith.subf %115, %118 : vector<3x8xf32>
    %120 = math.exp %119 : vector<3x8xf32>
    %cst_51 = arith.constant dense<0.000000e+00> : vector<3xf32>
    %121 = vector.multi_reduction <add>, %120, %cst_51 [1] : vector<3x8xf32> to vector<3xf32>
    %122 = vector.shape_cast %121 : vector<3xf32> to vector<3x1xf32>
    %123 = math.log %122 : vector<3x1xf32>
    %124 = arith.addf %123, %117 : vector<3x1xf32>
    %125 = vector.broadcast %124 : vector<3x1xf32> to vector<3x8xf32>
    %126 = arith.subf %115, %125 : vector<3x8xf32>
    %cst_52 = arith.constant 0.000000e+00 : f32
    %127 = vector.broadcast %cst_52 : f32 to vector<3x8xf32>
    %128 = arith.cmpf ogt, %4, %127 : vector<3x8xf32>
    %cst_53 = arith.constant 1.000000e+00 : f32
    %129 = vector.broadcast %cst_53 : f32 to vector<3x8xf32>
    %130 = arith.select %128, %4, %129 : vector<3x8xi1>, vector<3x8xf32>
    %cst_54 = arith.constant 0.000000e+00 : f32
    %131 = vector.broadcast %cst_54 : f32 to vector<3x8xf32>
    %132 = arith.cmpf ogt, %4, %131 : vector<3x8xf32>
    %133 = math.log %130 : vector<3x8xf32>
    %134 = arith.subf %133, %126 : vector<3x8xf32>
    %135 = arith.mulf %4, %134 : vector<3x8xf32>
    %cst_55 = arith.constant 0.000000e+00 : f32
    %136 = vector.broadcast %cst_55 : f32 to vector<3x8xf32>
    %137 = arith.select %132, %135, %136 : vector<3x8xi1>, vector<3x8xf32>
    %cst_56 = arith.constant dense<0.000000e+00> : vector<3xf32>
    %138 = vector.multi_reduction <add>, %137, %cst_56 [1] : vector<3x8xf32> to vector<3xf32>
    %139 = vector.shape_cast %138 : vector<3xf32> to vector<3x1xf32>
    %cst_57 = arith.constant dense<0.000000e+00> : vector<1xf32>
    %140 = vector.multi_reduction <add>, %139, %cst_57 [0] : vector<3x1xf32> to vector<1xf32>
    %141 = vector.shape_cast %140 : vector<1xf32> to vector<1x1xf32>
    %cst_58 = arith.constant 0.333333343 : f32
    %142 = vector.broadcast %cst_58 : f32 to vector<1x1xf32>
    %143 = arith.mulf %141, %142 : vector<1x1xf32>
    %cst_59 = arith.constant 0.000000e+00 : f32
    %144 = vector.broadcast %cst_59 : f32 to vector<1x1xf32>
    %145 = arith.maximumf %143, %144 : vector<1x1xf32>
    %c0_60 = arith.constant 0 : index
    %c0_61 = arith.constant 0 : index
    %146 = vector.load %arg11[%c0_60, %c0_61] : memref<1x1xf32, #tpu.memory_space<vmem>>, vector<1x1xf32>
    tpu.vector_store %arg11[%c0_60, %c0_61], %145 {strides = array<i32>} : memref<1x1xf32, #tpu.memory_space<vmem>>, vector<1x1xf32>,
    return
  }
}

</mosaic_0001>

<bundles_post_ra>
// kernel: vat_loss.5
= control target key start
LH: loop header
LB: loop body
LE: loop exit
PB: predicated region body
PF: predicated region fallthrough
CT: control target
= control target key end

     0   :  { %v128_v4 = vmov 0.0   ;;  %vm27_vm2 = vcmask 1043456   ;;  %s131_s17 = smov 80   ;;  %s132_s18 = smov 32   ;;  %vm104_vm3 = vcmask 130048   ;;  %vm106_vm4 = vcmask 261120   ;;  %s169_s0 = inlined_call_operand.vmem [shape: f32[12,128], index: 0, kind: input, shape index: {}]   ;;  %s170_s1 = inlined_call_operand.vmem [shape: f32[12,128], index: 1, kind: input, shape index: {}]   ;;  %s171_s2 = inlined_call_operand.vmem [shape: f32[4,48], index: 2, kind: output, shape index: {}]  }
   0x1   :  { %v11_v0 = vld [vmem:[%s169_s0] sm:$0xff]  ;;  %v12_v2 = vld [vmem:[%s169_s0 + $0x8] sm:$0xf]  ;;  %s129_s0 = smov 112   ;;  %s133_s19 = smov 64   ;;  %vm108_vm5 = vcmask 388096  }
   0x2   :  { %v13_v1 = vld [vmem:[%s170_s1] sm:$0xff]  ;;  %v14_v3 = vld [vmem:[%s170_s1 + $0x8] sm:$0xf]  ;;  %s130_s1 = smov 96   ;;  %s134_s20 = smov 16  }
   0x3   :  { %vm15_vm0 = vcmp.ne.f32.partialorder %v13_v1, 0.0  ;;  %vm16_vm1 = vcmp.ne.f32.partialorder %v14_v3, 0.0  ;;  %s135_s21 = smov 48  }
   0x4   :  { %v114_v5 = vsel %vm15_vm0, 1.0, %v128_v4  ;;  %v115_v6 = vsel %vm16_vm1, 1.0, %v128_v4 }
   0x5   :  { %v21_v7 = vmul.f32 %v114_v5, %v11_v0  ;;  %v22_v8 = vmul.f32 %v115_v6, %v12_v2 }
   0x7   :  { %v23_v9 = vmul.f32 %v21_v7, %v21_v7  ;;  %v24_v10 = vmul.f32 %v22_v8, %v22_v8 }
   0x9   :  { %25 = vadd.xlane.f32.xlu0 %v23_v9  ;;  %v28_v11 = vsel %vm27_vm2, %v24_v10, 0.0 }
   0xd   :  { %29 = vadd.xlane.f32.xlu0 %v28_v11 }
  0x96   :  { %v26_v12 = vpop.xlane.xlu0 %25 }
  0x97   :  { %v31_v13 = vadd.f32 1e-16, %v26_v12 }
  0x99   :  { %124 = vrsqrt.f32 %v31_v13 }
  0x9a   :  { %v30_v14 = vpop.xlane.xlu0 %29 }
  0x9b   :  { %v32_v15 = vadd.f32 1e-16, %v30_v14 }
  0x9d   :  { %126 = vrsqrt.f32 %v32_v15 }
  0xa3   :  { %v125_v16 = vpop.eup %124 }
  0xa4   :  { %v35_v17 = vmul.f32 %v125_v16, %v21_v7 }
  0xa6   :  { %38 = vrot.lane.b32.xlu1 %v35_v17, %s129_s0 }
  0xa7   :  { %v127_v18 = vpop.eup %126 }
  0xa8   :  { %v36_v19 = vmul.f32 %v127_v18, %v22_v8 }
  0xaa   :  { %42 = vrot.lane.b32.xlu1 %v35_v17, %s130_s1  ;;  %67 = vrot.lane.b32.xlu0 %v36_v19, %s129_s0 }
  0xae   :  { %46 = vrot.lane.b32.xlu1 %v35_v17, %s131_s17  ;;  %58 = vrot.lane.b32.xlu0 %v35_v17, %s132_s18 }
  0xb2   :  { %50 = vrot.lane.b32.xlu1 %v35_v17, %s133_s19  ;;  %62 = vrot.lane.b32.xlu0 %v35_v17, %s134_s20 }
  0xb6   :  { %54 = vrot.lane.b32.xlu1 %v35_v17, %s135_s21  ;;  %91 = vrot.lane.b32.xlu0 %v36_v19, %s134_s20 }
  0xba   :  { %71 = vrot.lane.b32.xlu1 %v36_v19, %s130_s1 }
  0xbe   :  { %75 = vrot.lane.b32.xlu1 %v36_v19, %s131_s17 }
  0xc2   :  { %79 = vrot.lane.b32.xlu1 %v36_v19, %s133_s19 }
  0xc6   :  { %83 = vrot.lane.b32.xlu1 %v36_v19, %s135_s21 }
  0xca   :  { %87 = vrot.lane.b32.xlu1 %v36_v19, %s132_s18 }
 0x118   :  { %v39_v20 = vpop.permute.xlu1 %38 }
 0x119   :  { %v41_v24 = vadd.f32 %v39_v20, %v35_v17 }
 0x11c   :  { %v43_v21 = vpop.permute.xlu1 %42  ;;  %v68_v22 = vpop.permute.xlu0 %67 }
 0x11d   :  { %v45_v25 = vadd.f32 %v43_v21, %v41_v24  ;;  %v70_v38 = vadd.f32 %v68_v22, %v36_v19 }
 0x120   :  { %v47_v23 = vpop.permute.xlu1 %46  ;;  %v59_v28 = vpop.permute.xlu0 %58 }
 0x121   :  { %v49_v27 = vadd.f32 %v47_v23, %v45_v25 }
 0x124   :  { %v51_v26 = vpop.permute.xlu1 %50  ;;  %v63_v33 = vpop.permute.xlu0 %62 }
 0x125   :  { %v53_v29 = vadd.f32 %v51_v26, %v49_v27 }
 0x128   :  { %v55_v30 = vpop.permute.xlu1 %54  ;;  %v92_v47 = vpop.permute.xlu0 %91 }
 0x129   :  { %v57_v31 = vadd.f32 %v55_v30, %v53_v29 }
 0x12b   :  { %v61_v32 = vadd.f32 %v59_v28, %v57_v31 }
 0x12c   :  { %v72_v34 = vpop.permute.xlu1 %71 }
 0x12d   :  { %v65_v35 = vadd.f32 %v63_v33, %v61_v32  ;;  %v74_v40 = vadd.f32 %v72_v34, %v70_v38 }
 0x12f   :  { %v96_v36 = vrot.slane %v65_v35, 4 }
 0x130   :  { %v76_v37 = vpop.permute.xlu1 %75 }
 0x131   :  { %97 = vrot.lane.b32.xlu1 %v96_v36, %s134_s20  ;;  %v78_v41 = vadd.f32 %v76_v37, %v74_v40 }
 0x134   :  { %v80_v39 = vpop.permute.xlu1 %79 }
 0x135   :  { %v82_v43 = vadd.f32 %v80_v39, %v78_v41 }
 0x138   :  { %v84_v42 = vpop.permute.xlu1 %83 }
 0x139   :  { %v86_v44 = vadd.f32 %v84_v42, %v82_v43 }
 0x13c   :  { %v88_v45 = vpop.permute.xlu1 %87 }
 0x13d   :  { %v90_v46 = vadd.f32 %v88_v45, %v86_v44 }
 0x13f   :  { %v94_v48 = vadd.f32 %v92_v47, %v90_v46 }
 0x141   :  { %101 = vrot.lane.b32.xlu0 %v94_v48, %s132_s18 }
 0x1a3   :  { %v98_v49 = vpop.permute.xlu1 %97 }
 0x1a4   :  { %v105_v50 = vsel %vm104_vm3, %v65_v35, %v98_v49 }
 0x1b3   :  { %v102_v51 = vpop.permute.xlu0 %101 }
 0x1b4   :  { %v107_v52 = vsel %vm106_vm4, %v105_v50, %v102_v51 }
 0x1b5   :  { %109 = vst.msk [vmem:[%s171_s2] sm:$0xf] %vm108_vm5, %v107_v52 }

// kernel: vat_loss.6
= control target key start
LH: loop header
LB: loop body
LE: loop exit
PB: predicated region body
PF: predicated region fallthrough
CT: control target
= control target key end

     0   :  { %s456_s25 = smov 112   ;;  %s457_s26 = smov 80   ;;  %v463_v17 = vmov 0.0   ;;  %vm464_vm0 = vmmov 0   ;;  %v465_v22 = vmov 0.0|0.0   ;;  %vm153_vm1 = vcmask 130048   ;;  %s596_s0 = inlined_call_operand.vmem [shape: f32[12,128], index: 0, kind: input, shape index: {}]   ;;  %s597_s1 = inlined_call_operand.vmem [shape: f32[48,8], index: 1, kind: input, shape index: {}]   ;;  %s598_s3 = inlined_call_operand.vmem [shape: f32[3,4], index: 3, kind: input, shape index: {}]   ;;  %s599_s5 = inlined_call_operand.vmem [shape: f32[3,48], index: 5, kind: output, shape index: {1}]   ;;  %s600_s2 = inlined_call_operand.vmem [shape: f32[1,8], index: 2, kind: input, shape index: {}]   ;;  %s601_s6 = inlined_call_operand.vmem [shape: f32[4,48], index: 6, kind: output, shape index: {2}]   ;;  %s602_s4 = inlined_call_operand.vmem [shape: f32[3,8], index: 4, kind: output, shape index: {0}]  }
   0x1   :  { %v504_v0 = vld [vmem:[%s596_s0 + $0x8] sm:$0xf]  ;;  %v509_v1 = vld [vmem:[%s596_s0] sm:$0xff]  ;;  %s458_s27 = smov 96   ;;  %s459_s28 = smov 64   ;;  %378 = vmatprep.subr.mxu0 %v463_v17  ;;  %380 = vmatprep.mubr.msk.f32.mxu0 %vm464_vm0, %v463_v17  ;;  %v238_v25 = vld [vmem:[%s597_s1 + $0x10] sm:$0xff] }
   0x2   :  { %84 = vrot.lane.b32.xlu1 %v504_v0, %s456_s25  ;;  %23 = vrot.lane.b32.xlu0 %v509_v1, %s456_s25  ;;  %s460_s0 = smov 48   ;;  %s461_s29 = smov 32   ;;  %v236_v23 = vld [vmem:[%s597_s1] sm:$0xff]  ;;  %v237_v24 = vld [vmem:[%s597_s1 + $0x8] sm:$0xff]  ;;  %vm155_vm2 = vcmask 261120   ;;  %vm162_vm3 = vcmask 1043456  }
   0x3   :  { %s462_s30 = smov 16   ;;  %395 = vmatprep.mubr.msk.f32.mxu1 %vm464_vm0, %v463_v17  ;;  %398 = vmatprep.subr.bf16.mxu1 %v465_v22  ;;  %v399_v28 = vpack.c.bf16 %v237_v24, %v236_v23  ;;  %v239_v29 = vld [vmem:[%s597_s1 + $0x18] sm:$0xff]  ;;  %v240_v35 = vld [vmem:[%s597_s1 + $0x20] sm:$0xff]  ;;  %v241_v36 = vld [vmem:[%s597_s1 + $0x28] sm:$0xff]  ;;  %vm158_vm4 = vcmask 31744   ;;  %vm51_vm5 = vcmp.ne.f32.partialorder %v509_v1, 0.0 }
   0x4   :  { %v402_v32 = vpack.c.bf16 %v239_v29, %v238_v25  ;;  %v405_v40 = vpack.c.bf16 %v241_v36, %v240_v35  ;;  %v157_v45 = vld [vmem:[%s598_s3] sm:$0x7]  ;;  %vm112_vm6 = vcmp.ne.f32.partialorder %v504_v0, 0.0  ;;  %v363_v47 = vsel %vm51_vm5, 1.0, %v463_v17 }
   0x5   :  { %400 = vmatpush3.bf16.msra.mxu1 %v399_v28  ;;  %v364_v48 = vsel %vm112_vm6, 1.0, %v463_v17  ;;  %vm336_vm7 = vcmask 387072   ;;  %vm249_vm8 = vcmask 392192   ;;  %v367_v60 = vld [vmem:[%s600_s2] ss:$0 sm:$0xff]  ;;  %vm323_vm9 = vcmask 59392  }
   0x6   :  { %31 = vrot.lane.b32.xlu1 %v509_v1, %s457_s26  ;;  %27 = vrot.lane.b32.xlu0 %v509_v1, %s458_s27  ;;  %v417_v49 = vpack.i.bf16 %v364_v48, %v363_v47  ;;  %vm349_vm10 = vcmask 388096  }
   0x7   :  { %401 = vmatprep.subr.bf16.mxu1 %v465_v22 }
   0x9   :  { %403 = vmatpush3.bf16.msra.mxu1 %v402_v32 }
   0xa   :  { %35 = vrot.lane.b32.xlu1 %v509_v1, %s459_s28  ;;  %88 = vrot.lane.b32.xlu0 %v504_v0, %s458_s27 }
   0xb   :  { %404 = vmatprep.subr.bf16.mxu1 %v465_v22 }
   0xd   :  { %406 = vmatpush3.bf16.msra.mxu1 %v405_v40 }
   0xe   :  { %39 = vrot.lane.b32.xlu1 %v509_v1, %s460_s0  ;;  %92 = vrot.lane.b32.xlu0 %v504_v0, %s457_s26 }
  0x12   :  { %43 = vrot.lane.b32.xlu1 %v509_v1, %s461_s29  ;;  %96 = vrot.lane.b32.xlu0 %v504_v0, %s459_s28 }
  0x16   :  { %47 = vrot.lane.b32.xlu1 %v509_v1, %s462_s30  ;;  %100 = vrot.lane.b32.xlu0 %v504_v0, %s460_s0 }
  0x1a   :  { %104 = vrot.lane.b32.xlu0 %v504_v0, %s461_s29  ;;  %108 = vrot.lane.b32.xlu1 %v504_v0, %s462_s30 }
  0x74   :  { %v85_v2 = vpop.permute.xlu1 %84  ;;  %v24_v3 = vpop.permute.xlu0 %23 }
  0x75   :  { %v26_v6 = vadd.f32 %v24_v3, %v509_v1  ;;  %v87_v13 = vadd.f32 %v85_v2, %v504_v0 }
  0x78   :  { %v32_v4 = vpop.permute.xlu1 %31  ;;  %v28_v5 = vpop.permute.xlu0 %27 }
  0x79   :  { %v30_v7 = vadd.f32 %v28_v5, %v26_v6 }
  0x7b   :  { %v34_v10 = vadd.f32 %v32_v4, %v30_v7 }
  0x7c   :  { %v36_v8 = vpop.permute.xlu1 %35  ;;  %v89_v9 = vpop.permute.xlu0 %88 }
  0x7d   :  { %v38_v14 = vadd.f32 %v36_v8, %v34_v10  ;;  %v91_v18 = vadd.f32 %v89_v9, %v87_v13 }
  0x80   :  { %v40_v11 = vpop.permute.xlu1 %39  ;;  %v93_v12 = vpop.permute.xlu0 %92 }
  0x81   :  { %v42_v19 = vadd.f32 %v40_v11, %v38_v14  ;;  %v95_v20 = vadd.f32 %v93_v12, %v91_v18 }
  0x84   :  { %v44_v15 = vpop.permute.xlu1 %43  ;;  %v97_v16 = vpop.permute.xlu0 %96 }
  0x85   :  { %v46_v21 = vadd.f32 %v44_v15, %v42_v19  ;;  %v99_v30 = vadd.f32 %v97_v16, %v95_v20 }
  0x88   :  { %v48_v26 = vpop.permute.xlu1 %47  ;;  %v101_v27 = vpop.permute.xlu0 %100 }
  0x89   :  { %v50_v31 = vadd.f32 %v48_v26, %v46_v21  ;;  %v103_v34 = vadd.f32 %v101_v27, %v99_v30 }
  0x8b   :  { %v145_v33 = vrot.slane %v50_v31, 4 }
  0x8c   :  { %v105_v37 = vpop.permute.xlu0 %104  ;;  %v109_v38 = vpop.permute.xlu1 %108 }
  0x8d   :  { %v107_v39 = vadd.f32 %v105_v37, %v103_v34  ;;  %146 = vrot.lane.b32.xlu0 %v145_v33, %s462_s30 }
  0x8f   :  { %v111_v41 = vadd.f32 %v109_v38, %v107_v39 }
  0x91   :  { %150 = vrot.lane.b32.xlu1 %v111_v41, %s461_s29 }
  0x95   :  { %418 = vrot.lane.b32.xlu1 %v417_v49, %s456_s25 }
  0x99   :  { %423 = vrot.lane.b32.xlu1 %v417_v49, %s458_s27 }
  0x9d   :  { %428 = vrot.lane.b32.xlu1 %v417_v49, %s457_s26 }
  0xa1   :  { %433 = vrot.lane.b32.xlu1 %v417_v49, %s459_s28 }
  0xa5   :  { %438 = vrot.lane.b32.xlu1 %v417_v49, %s460_s0 }
  0xa9   :  { %75 = vrot.lane.b32.xlu1 %v363_v47, %s461_s29 }
  0xad   :  { %79 = vrot.lane.b32.xlu1 %v363_v47, %s462_s30 }
  0xb1   :  { %136 = vrot.lane.b32.xlu1 %v364_v48, %s461_s29 }
  0xff   :  { %v147_v42 = vpop.permute.xlu0 %146 }
 0x100   :  { %v154_v43 = vsel %vm153_vm1, %v50_v31, %v147_v42 }
 0x103   :  { %v151_v44 = vpop.permute.xlu1 %150 }
 0x104   :  { %v156_v46 = vsel %vm155_vm2, %v154_v43, %v151_v44 }
 0x105   :  { %379 = vmatpush3.msk.msra.mxu0 %vm162_vm3, %v156_v46 }
 0x106   :  { %381 = vmatmul.mubr.msk.f32.vlgmr.msra.gmra.mrb[0].mxu0 %vm158_vm4, %v157_v45 }
 0x107   :  { %v419_v52 = vpop.permute.xlu1 %418 }
 0x108   :  { %v446_v53 = vadd.high.f32.bf16 %v364_v48, %v419_v52  ;;  %v450_v61 = vadd.low.f32.bf16 %v363_v47, %v419_v52 }
 0x10b   :  { %v424_v54 = vpop.permute.xlu1 %423 }
 0x10c   :  { %v447_v55 = vadd.high.f32.bf16 %v446_v53, %v424_v54  ;;  %v451_v1 = vadd.low.f32.bf16 %v450_v61, %v424_v54 }
 0x10f   :  { %v429_v56 = vpop.permute.xlu1 %428 }
 0x110   :  { %v448_v57 = vadd.high.f32.bf16 %v447_v55, %v429_v56  ;;  %v452_v3 = vadd.low.f32.bf16 %v451_v1, %v429_v56 }
 0x113   :  { %v434_v58 = vpop.permute.xlu1 %433 }
 0x114   :  { %v449_v59 = vadd.high.f32.bf16 %v448_v57, %v434_v58  ;;  %v453_v5 = vadd.low.f32.bf16 %v452_v3, %v434_v58 }
 0x117   :  { %v439_v4 = vpop.permute.xlu1 %438 }
 0x118   :  { %v454_v7 = vadd.low.f32.bf16 %v453_v5, %v439_v4  ;;  %v455_v9 = vadd.high.f32.bf16 %v449_v59, %v439_v4 }
 0x11b   :  { %v76_v6 = vpop.permute.xlu1 %75 }
 0x11c   :  { %v78_v8 = vadd.f32 %v454_v7, %v76_v6 }
 0x11f   :  { %v80_v10 = vpop.permute.xlu1 %79 }
 0x120   :  { %v82_v11 = vadd.f32 %v80_v10, %v78_v8 }
 0x122   :  { %v339_v12 = vrot.slane %v82_v11, 4 }
 0x123   :  { %v137_v13 = vpop.permute.xlu1 %136 }
 0x124   :  { %v139_v16 = vadd.f32 %v455_v9, %v137_v13 }
 0x1d9   :  { %v232_v50 = vpop.f32.mrb[0].mxu0 }
 0x1da   :  { %337 = vst.msk [vmem:[%s599_s5] sm:$0x7] %vm336_vm7, %v232_v50  ;;  %v382_v51 = vpop.f32.mrb[1].mxu0  ;;  %396 = vmatmul.mubr.msk.f32.vlgmr.msra.gmra.mrb[0].mxu1 %vm249_vm8, %v232_v50 }
 0x2ad   :  { %v319_v62 = vpop.f32.mrb[0].mxu1 }
 0x2ae   :  { %v320_v63 = vadd.f32 %v367_v60, %v319_v62  ;;  %v397_v0 = vpop.f32.mrb[1].mxu1 }
 0x2b0   :  { %v324_v2 = vsel %vm323_vm9, %v320_v63, -inf }
 0x2b1   :  { %325 = vmax.xlane.f32.xlu0 %v324_v2 }
 0x2c7   :  { %140 = vrot.lane.b32.xlu0 %v364_v48, %s462_s30 }
 0x2cb   :  { %340 = vrot.lane.b32.xlu0 %v339_v12, %s462_s30 }
 0x33e   :  { %v326_v14 = vpop.xlane.xlu0 %325 }
 0x33f   :  { %v327_v15 = vsub.f32 %v320_v63, %v326_v14 }
 0x341   :  { %v328_v17 = vmul.f32 1.442695, %v327_v15 }
 0x342   :  { %v141_v18 = vpop.permute.xlu0 %140 }
 0x343   :  { %442 = vpow2.f32 %v328_v17  ;;  %v143_v19 = vadd.f32 %v141_v18, %v139_v16 }
 0x345   :  { %344 = vrot.lane.b32.xlu0 %v143_v19, %s461_s29 }
 0x346   :  { %v341_v22 = vpop.permute.xlu0 %340 }
 0x347   :  { %v347_v23 = vsel %vm153_vm1, %v82_v11, %v341_v22 }
 0x34d   :  { %v443_v20 = vpop.eup %442 }
 0x34e   :  { %v330_v21 = vsel %vm323_vm9, %v443_v20, 0.0 }
 0x34f   :  { %331 = vadd.xlane.f32.xlu1 %v330_v21 }
 0x3b7   :  { %v345_v24 = vpop.permute.xlu0 %344 }
 0x3b8   :  { %v348_v25 = vsel %vm155_vm2, %v347_v23, %v345_v24 }
 0x3b9   :  { %350 = vst.msk [vmem:[%s601_s6] sm:$0xf] %vm349_vm10, %v348_v25 }
 0x3dc   :  { %v332_v26 = vpop.xlane.xlu1 %331 }
 0x3dd   :  { %444 = vrcp.f32 %v332_v26 }
 0x3e7   :  { %v445_v27 = vpop.eup %444 }
 0x3e8   :  { %v334_v28 = vmul.f32 %v445_v27, %v443_v20 }
 0x3ea   :  { %335 = vst.msk [vmem:[%s602_s4] sm:$0x7] %vm323_vm9, %v334_v28 }

// kernel: vat_loss.7
= control target key start
LH: loop header
LB: loop body
LE: loop exit
PB: predicated region body
PF: predicated region fallthrough
CT: control target
= control target key end

     0   :  { %vm58_vm0 = vcmask 1043456   ;;  %vm54_vm1 = vcmask 31744   ;;  %v792_v1 = vmov 0.0   ;;  %vm793_vm2 = vmmov 0   ;;  %s981_s0 = inlined_call_operand.vmem [shape: f32[4,48], index: 0, kind: input, shape index: {}]   ;;  %s982_s1 = inlined_call_operand.vmem [shape: f32[4,48], index: 1, kind: input, shape index: {}]   ;;  %s983_s2 = inlined_call_operand.vmem [shape: f32[3,48], index: 2, kind: input, shape index: {}]   ;;  %s984_s3 = inlined_call_operand.vmem [shape: f32[48,8], index: 3, kind: input, shape index: {}]   ;;  %s985_s4 = inlined_call_operand.vmem [shape: f32[8,48], index: 4, kind: input, shape index: {}]   ;;  %s986_s5 = inlined_call_operand.vmem [shape: f32[1,8], index: 5, kind: input, shape index: {}]   ;;  %s987_s6 = inlined_call_operand.vmem [shape: f32[3,4], index: 6, kind: input, shape index: {}]   ;;  %s988_s7 = inlined_call_operand.vmem [shape: f32[4,3], index: 7, kind: input, shape index: {}]   ;;  %s989_s8 = inlined_call_operand.vmem [shape: f32[3,8], index: 8, kind: input, shape index: {}]   ;;  %s990_s9 = inlined_call_operand.vmem [shape: f32[3,8], index: 9, kind: input, shape index: {}]   ;;  %s991_s10 = inlined_call_operand.vmem [shape: f32[3,8], index: 10, kind: input, shape index: {}]   ;;  %s992_s11 = inlined_call_operand.hbm [shape: f32[1,1], index: 11, kind: output, shape index: {}]  }
   0x1   :  { %v49_v0 = vld [vmem:[%s981_s0] sm:$0xf]  ;;  %676 = vmatprep.subr.mxu0 %v792_v1  ;;  %678 = vmatprep.mubr.msk.f32.mxu0 %vm793_vm2, %v792_v1  ;;  %v40_v4 = vld [vmem:[%s984_s3 + $0x8] sm:$0xff]  ;;  %v794_v5 = vmov 0.0|0.0   ;;  %v41_v7 = vld [vmem:[%s984_s3 + $0x10] sm:$0xff] }
   0x2   :  { %v867_v2 = vld [vmem:[%s987_s6] sm:$0x7]  ;;  %677 = vmatpush3.msk.msra.mxu0 %vm58_vm0, %v49_v0  ;;  %726 = vmatprep.subr.bf16.mxu1 %v794_v5  ;;  %v42_v8 = vld [vmem:[%s984_s3 + $0x18] sm:$0xff] }
   0x3   :  { %v39_v3 = vld [vmem:[%s984_s3] sm:$0xff]  ;;  %679 = vmatmul.mubr.msk.f32.vlgmr.msra.gmra.mrb[0].mxu0 %vm54_vm1, %v867_v2  ;;  %693 = vmatprep.mubr.msk.f32.mxu1 %vm793_vm2, %v792_v1 }
   0x4   :  { %v727_v6 = vpack.c.bf16 %v40_v4, %v39_v3 }
   0x5   :  { %16 = vsyncpa [#allocation3], 0  ;;  %v730_v9 = vpack.c.bf16 %v42_v8, %v41_v7  ;;  %696 = vmatprep.subr.mxu0 %v792_v1  ;;  %698 = vmatprep.mubr.msk.f32.mxu0 %vm793_vm2, %v792_v1  ;;  %v43_v10 = vld [vmem:[%s984_s3 + $0x20] sm:$0xff]  ;;  %v44_v11 = vld [vmem:[%s984_s3 + $0x28] sm:$0xff]  ;;  %vm140_vm3 = vcmask 392192   ;;  %vm215_vm4 = vcmask 59392  }
   0x6   :  { %728 = vmatpush3.bf16.msra.mxu1 %v727_v6  ;;  %v733_v12 = vpack.c.bf16 %v44_v11, %v43_v10  ;;  %v898_v13 = vld [vmem:[%s983_s2] sm:$0x7]  ;;  %vm240_vm6 = vcmask 1042432   ;;  %vm260_vm8 = vcmask 64512   ;;  %vm334_vm9 = vcmask 23552   ;;  %s795_s18 = smov 96  }
   0x7   :  { %729 = vmatprep.subr.bf16.mxu1 %v794_v5  ;;  %v907_v18 = vld [vmem:[%s986_s5] ss:$0 sm:$0xff]  ;;  %s796_s19 = smov 112   ;;  %vm413_vm10 = vcmask 125952   ;;  %vm445_vm11 = vcmask 130048   ;;  %vm447_vm12 = vcmask 261120  }
   0x8   :  { %v53_v20 = vld [vmem:[%s990_s9] sm:$0x7]  ;;  %vm627_vm13 = vcmask 0  }
   0x9   :  { %v918_v30 = vld [vmem:[%s989_s8] sm:$0x7] }
   0xa   :  { %731 = vmatpush3.bf16.msra.mxu1 %v730_v9  ;;  %vm230_vm5 = vcmp.gt.f32.partialorder %v918_v30, 0.0  ;;  %v252_v42 = vsel %vm215_vm4, %v918_v30, 0.0  ;;  %v51_v43 = vld [vmem:[%s985_s4] sm:$0xff] }
   0xb   :  { %732 = vmatprep.subr.bf16.mxu1 %v794_v5  ;;  %v231_v31 = vsel %vm230_vm5, %v918_v30, 1.0  ;;  %697 = vmatpush3.msra.mxu0 %v51_v43  ;;  %v52_v62 = vld [vmem:[%s988_s7] sm:$0xf] }
   0xc   :  { %701 = vmatprep.subr.mxu0 %v792_v1 }
   0xe   :  { %734 = vmatpush3.bf16.msra.mxu1 %v733_v12 }
   0xf   :  { %735 = vmatprep.subr.bf16.mxu1 %v794_v5 }
  0xd6   :  { %v128_v14 = vpop.f32.mrb[0].mxu0 }
  0xd7   :  { %v132_v15 = vmul.f32 10.0, %v128_v14  ;;  %v680_v16 = vpop.f32.mrb[1].mxu0 }
  0xd9   :  { %v133_v17 = vadd.f32 %v132_v15, %v898_v13 }
  0xdb   :  { %694 = vmatmul.mubr.msk.f32.vlgmr.msra.gmra.mrb[0].mxu1 %vm140_vm3, %v133_v17 }
  0xdc   :  { %737 = vmatpush3.bf16.msra.mxu1 %v727_v6  ;;  %723 = vmatprep.mubr.msk.f32.mxu1 %vm793_vm2, %v792_v1 }
  0xdd   :  { %738 = vmatprep.subr.bf16.mxu1 %v794_v5 }
  0xe0   :  { %740 = vmatpush3.bf16.msra.mxu1 %v730_v9 }
  0xe1   :  { %741 = vmatprep.subr.bf16.mxu1 %v794_v5 }
  0xe4   :  { %743 = vmatpush3.bf16.msra.mxu1 %v733_v12 }
 0x1ae   :  { %v210_v19 = vpop.f32.mrb[0].mxu1 }
 0x1af   :  { %v211_v21 = vadd.f32 %v907_v18, %v210_v19  ;;  %v695_v22 = vpop.f32.mrb[1].mxu1 }
 0x1b1   :  { %v214_v23 = vmul.f32 %v211_v21, %v53_v20 }
 0x1b3   :  { %v216_v24 = vsel %vm215_vm4, %v214_v23, -inf }
 0x1b4   :  { %217 = vmax.xlane.f32.xlu0 %v216_v24 }
 0x241   :  { %v218_v25 = vpop.xlane.xlu0 %217 }
 0x242   :  { %v219_v26 = vsub.f32 %v214_v23, %v218_v25 }
 0x244   :  { %v220_v27 = vmul.f32 1.442695, %v219_v26 }
 0x246   :  { %750 = vpow2.f32 %v220_v27 }
 0x247   :  { %752 = vlog2.f32 %v231_v31 }
 0x250   :  { %v751_v28 = vpop.eup %750 }
 0x251   :  { %v222_v29 = vsel %vm215_vm4, %v751_v28, 0.0  ;;  %v753_v33 = vpop.eup %752 }
 0x252   :  { %223 = vadd.xlane.f32.xlu0 %v222_v29  ;;  %v924_v36 = vmul.f32 0.6931472, %v753_v33 }
 0x2df   :  { %v224_v32 = vpop.xlane.xlu0 %223 }
 0x2e0   :  { %754 = vlog2.f32 %v224_v32 }
 0x2e1   :  { %756 = vrcp.f32 %v224_v32 }
 0x2ea   :  { %v755_v34 = vpop.eup %754 }
 0x2eb   :  { %v228_v35 = vmul.f32 0.6931472, %v755_v34  ;;  %v757_v50 = vpop.eup %756 }
 0x2ec   :  { %v226_v54 = vmul.f32 %v757_v50, %v751_v28 }
 0x2ed   :  { %v229_v37 = vsub.f32 %v219_v26, %v228_v35  ;;  %v50_v26 = vld [vmem:[%s982_s1] sm:$0xf] }
 0x2ef   :  { %v234_v38 = vsub.f32 %v924_v36, %v229_v37 }
 0x2f1   :  { %v235_v39 = vmul.f32 %v234_v38, %v918_v30 }
 0x2f3   :  { %v236_v40 = vsel %vm230_vm5, %v235_v39, 0.0 }
 0x2f4   :  { %v237_v41 = vsel %vm215_vm4, %v236_v40, 0.0 }
 0x2f5   :  { %238 = vadd.xlane.f32.xlu1 %v237_v41  ;;  %v597_v41 = vld [vmem:[%s991_s10] sm:$0x7]  ;;  %s797_s10 = smov [#allocation2]  }
 0x2f6   :  { %s635_s22 = sshll.u32 %s797_s10, 4  ;;  %s636_s22 = int_to_ptr.vmem [resolvable:$true] %s635_s22 }
 0x2f7   :  { %s768_s23 = scalar_lea.vmem %s636_s22, 16  ;;  %s772_s0 = scalar_lea.vmem %s636_s22, 32 }
 0x2f8   :  { %p769_p0 = scmp.ne.s32.totalorder %s636_s22, %s768_s23  ;;  %p773_p1 = scmp.lt.s32.totalorder %s636_s22, %s636_s22 }
 0x2f9   :  { %253 = vadd.xlane.f32.xlu1 %v252_v42  ;;  %p774_p2 = scmp.lt.s32.totalorder %s772_s0, %s768_s23 }
 0x2fb   :  { %p775_p3 = por %p774_p2, %p773_p1 }
 0x2fd   :  { %p776_p4 = pnand %p775_p3, %p769_p0 }
 0x382   :  { %v239_v44 = vpop.xlane.xlu1 %238 }
 0x383   :  { %v241_v45 = vsel %vm240_vm6, %v239_v44, 0.0 }
 0x384   :  { %v242_v46 = vrot.slane %v241_v45, 4 }
 0x386   :  { %v243_v47 = vadd.f32 %v242_v46, %v241_v45  ;;  %v254_v52 = vpop.xlane.xlu1 %253 }
 0x387   :  { %v255_v56 = vmul.f32 %v254_v52, %v226_v54 }
 0x388   :  { %v244_v48 = vrot.slane %v243_v47, 2 }
 0x389   :  { %v256_v59 = vsub.f32 %v255_v56, %v918_v30 }
 0x38a   :  { %v245_v49 = vadd.f32 %v244_v48, %v243_v47 }
 0x38c   :  { %v246_v51 = vrot.slane %v245_v49, 1 }
 0x38e   :  { %v247_v53 = vadd.f32 %v246_v51, %v245_v49 }
 0x390   :  { %v248_v55 = vmul.f32 0.33333334, %v247_v53 }
 0x392   :  { %vm249_vm7 = vcmp.gt.f32.partialorder %v248_v55, 0.0 }
 0x393   :  { %v647_v57 = vsel %vm249_vm7, 1.0, %v792_v1 }
 0x394   :  { %v257_v58 = vmul.f32 0.33333334, %v647_v57 }
 0x396   :  { %v258_v60 = vmul.f32 %v257_v58, %v256_v59 }
 0x398   :  { %v259_v61 = vmul.f32 %v258_v60, %v53_v20 }
 0x39a   :  { %699 = vmatmul.mubr.msk.f32.vlgmr.msra.gmra.mrb[2].mxu0 %vm260_vm8, %v259_v61 }
 0x39b   :  { %703 = vmatprep.mubr.msk.f32.mxu0 %vm793_vm2, %v792_v1 }
 0x46d   :  { %v330_v63 = vpop.f32.mrb[2].mxu0 }
 0x46e   :  { %v700_v0 = vpop.f32.mrb[3].mxu0  ;;  %702 = vmatpush3.msk.msra.mxu0 %vm240_vm6, %v330_v63 }
 0x46f   :  { %704 = vmatmul.mubr.msk.f32.vlgmr.msra.gmra.mrb[4].mxu0 %vm334_vm9, %v52_v62  ;;  %706 = vmatprep.subr.mxu0 %v792_v1 }
 0x470   :  { %708 = vmatprep.mubr.msk.f32.mxu0 %vm793_vm2, %v792_v1 }
 0x542   :  { %v407_v3 = vpop.f32.mrb[4].mxu0 }
 0x543   :  { %v411_v4 = vmul.f32 10.0, %v407_v3  ;;  %v705_v5 = vpop.f32.mrb[5].mxu0 }
 0x545   :  { %v412_v6 = vmul.f32 %v411_v4, %v411_v4 }
 0x547   :  { %434 = vrot.lane.b32.xlu1 %v412_v6, %s795_s18  ;;  %423 = vrot.lane.b32.xlu0 %v412_v6, %s796_s19  ;;  %v414_v7 = vsel %vm413_vm10, %v412_v6, 0.0 }
 0x56b   :  { %415 = vadd.xlane.f32.xlu1 %v414_v7 }
 0x5b9   :  { %v424_v8 = vpop.permute.xlu0 %423  ;;  %v435_v10 = vpop.permute.xlu1 %434 }
 0x5ba   :  { %v426_v9 = vsel %vm413_vm10, %v424_v8, 0.0  ;;  %v437_v11 = vsel %vm413_vm10, %v435_v10, 0.0 }
 0x5bb   :  { %427 = vadd.xlane.f32.xlu0 %v426_v9 }
 0x5bf   :  { %438 = vadd.xlane.f32.xlu0 %v437_v11 }
 0x5f8   :  { %v416_v12 = vpop.xlane.xlu1 %415 }
 0x5f9   :  { %v417_v14 = vmul.f32 8.0, %v416_v12 }
 0x5fb   :  { %v418_v1 = vadd.f32 1e-16, %v417_v14 }
 0x5fd   :  { %758 = vrsqrt.f32 %v418_v1 }
 0x607   :  { %v759_v22 = vpop.eup %758 }
 0x608   :  { %v420_v25 = vmul.f32 %v759_v22, %v411_v4 }
 0x60a   :  { %v421_v31 = vmul.f32 %v420_v25, %v50_v26 }
 0x648   :  { %v428_v15 = vpop.xlane.xlu0 %427 }
 0x649   :  { %v429_v16 = vmul.f32 8.0, %v428_v15 }
 0x64b   :  { %v430_v17 = vadd.f32 1e-16, %v429_v16 }
 0x64c   :  { %v439_v19 = vpop.xlane.xlu0 %438 }
 0x64d   :  { %760 = vrsqrt.f32 %v430_v17  ;;  %v440_v20 = vmul.f32 8.0, %v439_v19 }
 0x64f   :  { %v441_v21 = vadd.f32 1e-16, %v440_v20 }
 0x651   :  { %762 = vrsqrt.f32 %v441_v21 }
 0x657   :  { %v761_v23 = vpop.eup %760 }
 0x658   :  { %v432_v24 = vmul.f32 %v761_v23, %v411_v4 }
 0x65a   :  { %v433_v28 = vmul.f32 %v432_v24, %v50_v26 }
 0x65b   :  { %v763_v27 = vpop.eup %762 }
 0x65c   :  { %v443_v29 = vmul.f32 %v763_v27, %v411_v4  ;;  %v446_v33 = vsel %vm445_vm11, %v421_v31, %v433_v28 }
 0x65e   :  { %v444_v32 = vmul.f32 %v443_v29, %v50_v26 }
 0x660   :  { %v448_v34 = vsel %vm447_vm12, %v446_v33, %v444_v32 }
 0x661   :  { %707 = vmatpush3.msk.msra.mxu0 %vm58_vm0, %v448_v34 }
 0x662   :  { %709 = vmatmul.mubr.msk.f32.vlgmr.msra.gmra.mrb[6].mxu0 %vm54_vm1, %v867_v2 }
 0x735   :  { %v518_v35 = vpop.f32.mrb[6].mxu0 }
 0x736   :  { %v522_v37 = vmul.f32 10.0, %v518_v35  ;;  %v710_v38 = vpop.f32.mrb[7].mxu0 }
 0x738   :  { %v523_v39 = vadd.f32 %v522_v37, %v898_v13 }
 0x73a   :  { %724 = vmatmul.mubr.msk.f32.vlgmr.msra.gmra.mrb[2].mxu1 %vm140_vm3, %v523_v39 }
 0x80d   :  { %v593_v40 = vpop.f32.mrb[2].mxu1 }
 0x80e   :  { %v594_v42 = vadd.f32 %v907_v18, %v593_v40  ;;  %v725_v43 = vpop.f32.mrb[3].mxu1 }
 0x810   :  { %v598_v44 = vmul.f32 %v597_v41, %v594_v42 }
 0x812   :  { %v599_v45 = vsel %vm215_vm4, %v598_v44, -inf }
 0x813   :  { %600 = vmax.xlane.f32.xlu1 %v599_v45 }
 0x8a0   :  { %v601_v2 = vpop.xlane.xlu1 %600 }
 0x8a1   :  { %v602_v46 = vsub.f32 %v598_v44, %v601_v2 }
 0x8a3   :  { %v603_v47 = vmul.f32 1.442695, %v602_v46 }
 0x8a5   :  { %764 = vpow2.f32 %v603_v47 }
 0x8af   :  { %v765_v48 = vpop.eup %764 }
 0x8b0   :  { %v605_v13 = vsel %vm215_vm4, %v765_v48, 0.0 }
 0x8b1   :  { %606 = vadd.xlane.f32.xlu0 %v605_v13 }
 0x93e   :  { %v607_v49 = vpop.xlane.xlu0 %606 }
 0x93f   :  { %766 = vlog2.f32 %v607_v49 }
 0x949   :  { %v767_v50 = vpop.eup %766 }
 0x94a   :  { %v609_v51 = vmul.f32 0.6931472, %v767_v50 }
 0x94c   :  { %v610_v52 = vadd.f32 %v609_v51, %v601_v2 }
 0x94e   :  { %v611_v53 = vsub.f32 %v598_v44, %v610_v52 }
 0x950   :  { %v612_v18 = vsub.f32 %v924_v36, %v611_v53 }
 0x952   :  { %v613_v54 = vmul.f32 %v612_v18, %v918_v30 }
 0x954   :  { %v614_v55 = vsel %vm230_vm5, %v613_v54, 0.0 }
 0x955   :  { %v615_v56 = vsel %vm215_vm4, %v614_v55, 0.0 }
 0x956   :  { %616 = vadd.xlane.f32.xlu1 %v615_v56 }
 0x9e3   :  { %v617_v57 = vpop.xlane.xlu1 %616 }
 0x9e4   :  { %v618_v58 = vsel %vm240_vm6, %v617_v57, 0.0 }
 0x9e5   :  { %v619_v59 = vrot.slane %v618_v58, 4 }
 0x9e7   :  { %v620_v60 = vadd.f32 %v619_v59, %v618_v58 }
 0x9e9   :  { %v621_v61 = vrot.slane %v620_v60, 2 }
 0x9eb   :  { %v622_v62 = vadd.f32 %v621_v61, %v620_v60 }
 0x9ed   :  { %v623_v63 = vrot.slane %v622_v62, 1 }
 0x9ef   :  { %v624_v0 = vadd.f32 %v623_v63, %v622_v62 }
 0x9f1   :  { %v625_v36 = vmul.f32 0.33333334, %v624_v0 }
 0x9f3   :  { %v626_v3 = vmax.f32 %v625_v36, 0.0 }
 0x9f5   :  { %628 = vst.msk [vmem:[#allocation2] sm:$0x1] %vm627_vm13, %v626_v3 }
 0x9f6   :  { %779 = shalt.err (!%p776_p4)
}
 0x9f7   :  { %s780_s26 = scalar_lea.hbm %s992_s11, 16 }
 0x9f8   :  { %p781_p5 = scmp.ne.s32.totalorder %s992_s11, %s780_s26  ;;  %p784_p6 = scmp.lt.u32.totalorder %s780_s26, %s992_s11 }
 0x9fa   :  { %p786_p7 = pnand %p784_p6, %p781_p5 }
 0x9fc   :  { %789 = shalt.err (!%p786_p7)
}
 0x9fd   :  { %638 = dma.vmem_to_hbm [thread:$0]  %s636_s22, 16, %s992_s11, [#allocation3]  }
 0x9fe   :  { %790 = dma.done.wait [#allocation3], 16  }
 0x9ff   :  { %791 = vsyncadd [#allocation3], 4294967280 }
 0xa00   :  { %642 = vsyncpa [#allocation3], 1 }

</bundles_post_ra>
